<compile_context>
chip_gen: v7x
topology: tpu7x:2x2x1
jax: 0.10.0
libtpu: 0.0.40
codegen_flags: <defaults>
</compile_context>

<pallas_src>
from functools import partial

import jax
import jax.numpy as jnp
from jax import lax
from jax.experimental import pallas as pl
from jax.experimental.pallas import tpu as pltpu


def _cpe_kernel(x_ref, top_ref, bot_ref, y_ref, wg_ref, bg_ref, wb_ref, bb_ref,
                tilem_ref, wc_ref, bc_ref, out_ref, seg_ref, segt_ref,
                *, eps, C, W, TH):
    """Fused depthwise 3x3 conv + residual + LayerNorm + adaLN modulate."""
    WC = W * C

    # ---- LayerNorm segment-sum matrices, generated on-chip once per image ----
    #   seg  (WC, W): seg[j, w]  = 1  iff  w*C <= j < (w+1)*C   (C-group sums)
    #   segt (W, WC): transpose                                  (broadcast back)
    # Built with mul/compare only (no integer div/mod), kept in VMEM scratch so
    # they are neither read from HBM nor double-buffered every grid step.
    @pl.when(pl.program_id(1) == 0)
    def _():
        jj = lax.broadcasted_iota(jnp.int32, (WC, W), 0)
        ww = lax.broadcasted_iota(jnp.int32, (WC, W), 1) * C
        seg_ref[...] = ((jj >= ww) & (jj < ww + C)).astype(jnp.float32)
        jt = lax.broadcasted_iota(jnp.int32, (W, WC), 1)
        wt = lax.broadcasted_iota(jnp.int32, (W, WC), 0) * C
        segt_ref[...] = ((jt >= wt) & (jt < wt + C)).astype(jnp.float32)

    # ---- adaLN modulation folded with the LayerNorm affine --------------------
    #   g' = gamma*(1+scale), b' = beta*(1+scale)+shift  (folding done host-side)
    # Two tiny MXU matmuls produce per-channel g'/b'; one more against the
    # (C, W*C) tile matrix lane-tiles them W times.  Recomputed per row tile
    # (cheaper than a guarded scratch).
    y = y_ref[0].astype(jnp.float32)                                     # (1, C)
    s = y * jax.nn.sigmoid(y)                                            # SiLU
    g_small = jnp.dot(s, wg_ref[...], preferred_element_type=jnp.float32) + bg_ref[...]
    b_small = jnp.dot(s, wb_ref[...], preferred_element_type=jnp.float32) + bb_ref[...]
    g_full = jnp.dot(g_small, tilem_ref[...], preferred_element_type=jnp.float32)  # (1, WC)
    b_full = jnp.dot(b_small, tilem_ref[...], preferred_element_type=jnp.float32)  # (1, WC)

    # ---- depthwise 3x3 conv on a (TH+2, WC) halo-extended tile ----------------
    # kw = +-1 taps are lane rolls by +-C; the wrapped-around lanes are already
    # killed by the host-side zeroing of the corresponding tap weights.
    x_tile = x_ref[0].astype(jnp.float32)                                # (TH, WC)
    x_ext = jnp.concatenate(
        [top_ref[0, 0].astype(jnp.float32), x_tile, bot_ref[0, 0].astype(jnp.float32)],
        axis=0)                                                          # (TH+2, WC)
    x_m1 = pltpu.roll(x_ext, C, axis=1)                                  # left  neighbour (w-1)
    x_p1 = pltpu.roll(x_ext, WC - C, axis=1)                             # right neighbour (w+1)

    acc = None
    for kh in range(3):                      # output row i uses extended rows i .. i+2
        prow = (wc_ref[kh, 0:1, :] * x_m1
                + wc_ref[kh, 1:2, :] * x_ext
                + wc_ref[kh, 2:3, :] * x_p1)                             # (TH+2, WC)
        part = prow[kh:kh + TH, :]
        acc = part if acc is None else acc + part

    h = acc + bc_ref[...] + x_tile                                       # bias + residual

    # ---- LayerNorm over each C-group of the collapsed lane axis (MXU) --------
    seg = seg_ref[...]
    segt = segt_ref[...]
    inv_c = 1.0 / C
    mean = jnp.dot(h, seg, preferred_element_type=jnp.float32) * inv_c          # (TH, W)
    cen = h - jnp.dot(mean, segt, preferred_element_type=jnp.float32)           # (TH, WC)
    var = jnp.dot(cen * cen, seg, preferred_element_type=jnp.float32) * inv_c   # (TH, W)
    rstd = lax.rsqrt(var + eps)                                                  # (TH, W)
    rstd_full = jnp.dot(rstd, segt, preferred_element_type=jnp.float32)          # (TH, WC)

    out_ref[0] = (cen * (rstd_full * g_full) + b_full).astype(out_ref.dtype)


def _pick_row_tile(H, max_rows=128):
    """Largest divisor of H that is <= max_rows (prefer multiples of 8)."""
    if H <= max_rows:
        return H
    divisors = [t for t in range(1, max_rows + 1) if H % t == 0]
    mult8 = [t for t in divisors if t % 8 == 0]
    pool = mult8 if mult8 else divisors
    return max(pool) if pool else H


def ada_in_pos_cnn(x, y, H, W, params, *, stride=1, eps=1e-5, tile_rows=None):
    """Forward pass of AdaInPosCNN. x: (B, T=H*W, C), y: (B, C).

    Output dtype == x dtype (pass bf16 x for bf16 HBM I/O; internal math is fp32).
    """
    # TODO(synk): stride != 1 path (strided depthwise conv, no residual) not implemented.
    assert stride == 1
    B, T, C = x.shape
    assert T == H * W
    WC = W * C

    TH = tile_rows if tile_rows is not None else _pick_row_tile(H)
    assert H % TH == 0, "row tile must divide H"
    nrt = H // TH

    f32 = jnp.float32
    gamma = params["ln_gamma"].astype(f32)
    beta = params["ln_beta"].astype(f32)
    w_mod = params["w_mod"].astype(f32)                      # (C, 2C)
    b_mod = params["b_mod"].reshape(-1).astype(f32)          # (2C,)

    # Fold LayerNorm affine + adaLN modulate into two small linears:
    #   g' = gamma*(1+scale) = SiLU(y) @ w_g + b_g
    #   b' = beta*(1+scale)+shift = SiLU(y) @ w_b + b_b
    w_shift, w_scale = w_mod[:, :C], w_mod[:, C:]
    b_shift, b_scale = b_mod[:C], b_mod[C:]
    w_g = w_scale * gamma[None, :]                           # (C, C)
    b_g = (gamma * (1.0 + b_scale))[None, :]                 # (1, C)
    w_b = w_scale * beta[None, :] + w_shift                  # (C, C)
    b_b = (beta * (1.0 + b_scale) + b_shift)[None, :]        # (1, C)

    # Lane-tile matrix: tile_mat[c, w*C + c'] = delta(c, c')  -> (C, W*C).
    tile_mat = jnp.tile(jnp.eye(C, dtype=f32), (1, W))

    # Depthwise taps tiled W times along the lane axis, with the w=0 / w=W-1
    # zero padding folded into the kw=0 / kw=2 taps (no in-kernel edge masks).
    lane = jnp.arange(WC)
    wct = jnp.tile(params["w_conv"].astype(f32), (1, 1, W))                  # (3, 3, WC)
    wct = jnp.stack([wct[:, 0, :] * (lane >= C).astype(f32),
                     wct[:, 1, :],
                     wct[:, 2, :] * (lane < WC - C).astype(f32)], axis=1)
    bct = jnp.tile(params["b_conv"].astype(f32), W)[None, :]                 # (1, WC)

    # (B, T, C) -> (B, H, W*C): identical row-major memory, lane-dense last dim.
    x_lane = x.reshape(B, H, WC)
    y3 = y.reshape(B, 1, C)

    # Halo rows for the kh = +-1 taps at row-tile boundaries (zeros at the true
    # image border, matching the conv zero padding).  Shape (B, nrt, 1, WC).
    zero_row = jnp.zeros((B, 1, 1, WC), x.dtype)
    if nrt > 1:
        top_rows = x_lane[:, TH - 1:H - 1:TH, :][:, :, None, :]   # rows above tiles 1..nrt-1
        bot_rows = x_lane[:, TH:H:TH, :][:, :, None, :]           # rows below tiles 0..nrt-2
        halo_top = jnp.concatenate([zero_row, top_rows], axis=1)
        halo_bot = jnp.concatenate([bot_rows, zero_row], axis=1)
    else:
        halo_top, halo_bot = zero_row, zero_row

    # VMEM budget: double-buffered I/O blocks + fp32 temporaries + constants.
    # (v7x: 64 MiB physical / 32 MiB default scoped; v5e: 16 MiB default scoped.)
    itemsize = jnp.dtype(x.dtype).itemsize
    est = (12 * 4 * (TH + 2) * WC                 # ~12 live fp32 (TH+2, WC) temporaries
           + 2 * 2 * TH * WC * itemsize           # x / out blocks, double-buffered
           + 4 * (2 * WC * W + C * WC + 12 * WC + 2 * C * C + 4 * C))
    vmem_limit = int(min(48 * 2 ** 20, max(32 * 2 ** 20, 2 * est)))

    out = pl.pallas_call(
        partial(_cpe_kernel, eps=eps, C=C, W=W, TH=TH),
        grid=(B, nrt),
        in_specs=[
            pl.BlockSpec((1, TH, WC), lambda b, r: (b, r, 0)),      # x tile (read once)
            pl.BlockSpec((1, 1, 1, WC), lambda b, r: (b, r, 0, 0)),  # halo row above
            pl.BlockSpec((1, 1, 1, WC), lambda b, r: (b, r, 0, 0)),  # halo row below
            pl.BlockSpec((1, 1, C), lambda b, r: (b, 0, 0)),        # y
            pl.BlockSpec((C, C), lambda b, r: (0, 0)),              # folded scale weight
            pl.BlockSpec((1, C), lambda b, r: (0, 0)),              # folded scale bias
            pl.BlockSpec((C, C), lambda b, r: (0, 0)),              # folded shift weight
            pl.BlockSpec((1, C), lambda b, r: (0, 0)),              # folded shift bias
            pl.BlockSpec((C, WC), lambda b, r: (0, 0)),             # lane-tile matrix
            pl.BlockSpec((3, 3, WC), lambda b, r: (0, 0, 0)),       # edge-folded conv taps
            pl.BlockSpec((1, WC), lambda b, r: (0, 0)),             # tiled conv bias
        ],
        out_specs=pl.BlockSpec((1, TH, WC), lambda b, r: (b, r, 0)),
        out_shape=jax.ShapeDtypeStruct((B, H, WC), x.dtype),
        scratch_shapes=[
            pltpu.VMEM((WC, W), jnp.float32),    # seg  (generated in-kernel)
            pltpu.VMEM((W, WC), jnp.float32),    # segt (generated in-kernel)
        ],
        compiler_params=pltpu.CompilerParams(
            # Batch axis sharded across TensorCores; row axis kept "arbitrary"
            # so the r == 0 scratch (re)generation is guaranteed to run on each
            # core before the rows that read it.
            dimension_semantics=("parallel", "arbitrary"),
            vmem_limit_bytes=vmem_limit),
    )(x_lane, halo_top, halo_bot, y3, w_g, b_g, w_b, b_b, tile_mat, wct, bct)

    return out.reshape(B, T, C)


def reference(x, y, H, W, params, eps=1e-5):
    """Pure-JAX reference matching the PyTorch forward semantics (stride=1)."""
    B, T, C = x.shape
    x_nhwc = x.reshape(B, H, W, C)
    rhs = params["w_conv"].reshape(3, 3, 1, C)                  # HWIO, depthwise
    conv = jax.lax.conv_general_dilated(
        x_nhwc, rhs, window_strides=(1, 1), padding=((1, 1), (1, 1)),
        dimension_numbers=("NHWC", "HWIO", "NHWC"), feature_group_count=C)
    conv = conv + params["b_conv"]
    h = (conv + x_nhwc).reshape(B, T, C)
    mean = jnp.mean(h, -1, keepdims=True)
    var = jnp.mean((h - mean) ** 2, -1, keepdims=True)
    normed = (h - mean) / jnp.sqrt(var + eps)
    normed = normed * params["ln_gamma"] + params["ln_beta"]
    s = y * jax.nn.sigmoid(y)
    mod = s @ params["w_mod"] + params["b_mod"]
    shift, scale = mod[:, :C], mod[:, C:]
    return normed * (1.0 + scale[:, None, :]) + shift[:, None, :]


if __name__ == "__main__":
    key = jax.random.PRNGKey(0)
    B, C, H, W = 2, 32, 16, 8         # in_channels == n_embd == 32 (depthwise conv)
    T = H * W
    keys = jax.random.split(key, 8)

    x = jax.random.normal(keys[0], (B, T, C), jnp.float32)
    y = jax.random.normal(keys[1], (B, C), jnp.float32)

    # Deterministic synthetic parameters (shapes implied by the module __init__).
    params = {
        "w_conv": 0.1 * jax.random.normal(keys[2], (3, 3, C), jnp.float32),       # Conv2d(C,C,3,groups=C)
        "b_conv": 0.1 * jax.random.normal(keys[3], (C,), jnp.float32),
        "ln_gamma": 1.0 + 0.05 * jax.random.normal(keys[4], (C,), jnp.float32),   # LayerNorm(C)
        "ln_beta": 0.05 * jax.random.normal(keys[5], (C,), jnp.float32),
        "w_mod": (1.0 / jnp.sqrt(C)) * jax.random.normal(keys[6], (C, 2 * C), jnp.float32),  # Linear(C, 2C)
        "b_mod": 0.1 * jax.random.normal(keys[7], (1, 2 * C), jnp.float32),
    }

    # tile_rows=8 -> two row tiles per image: exercises the halo path.
    out = jax.block_until_ready(ada_in_pos_cnn(x, y, H, W, params, tile_rows=8))
    ref = reference(x, y, H, W, params)

    assert out.shape == (B, T, C), out.shape
    assert jnp.allclose(out, ref, rtol=1e-4, atol=1e-4), \
        float(jnp.max(jnp.abs(out - ref)))
    print("KERNEL_OK")
</pallas_src>

<mosaic_0001>
module attributes {stable_mosaic.version = 11 : i64} {
  func.func @_cpe_kernel(%arg0: i32, %arg1: i32, %arg2: memref<1x8x256xf32, #tpu.memory_space<vmem>>, %arg3: memref<1x1x1x256xf32, #tpu.memory_space<vmem>>, %arg4: memref<1x1x1x256xf32, #tpu.memory_space<vmem>>, %arg5: memref<1x1x32xf32, #tpu.memory_space<vmem>>, %arg6: memref<32x32xf32, #tpu.memory_space<vmem>>, %arg7: memref<1x32xf32, #tpu.memory_space<vmem>>, %arg8: memref<32x32xf32, #tpu.memory_space<vmem>>, %arg9: memref<1x32xf32, #tpu.memory_space<vmem>>, %arg10: memref<32x256xf32, #tpu.memory_space<vmem>>, %arg11: memref<3x3x256xf32, #tpu.memory_space<vmem>>, %arg12: memref<1x256xf32, #tpu.memory_space<vmem>>, %arg13: memref<1x8x256xf32, #tpu.memory_space<vmem>>, %arg14: memref<256x8xf32, #tpu.memory_space<vmem>>, %arg15: memref<8x256xf32, #tpu.memory_space<vmem>>) attributes {dimension_semantics = [#tpu.dimension_semantics<parallel>, #tpu.dimension_semantics<arbitrary>], iteration_bounds = array<i64: 2, 2>, scalar_prefetch = 0 : i64, scratch_operands = 2 : i64, tpu.core_type = #tpu.core_type<tc>, window_params = [{transform_indices = @transform_0, window_bounds = array<i64: 1, 8, 256>}, {transform_indices = @transform_1, window_bounds = array<i64: 1, 1, 1, 256>}, {transform_indices = @transform_2, window_bounds = array<i64: 1, 1, 1, 256>}, {transform_indices = @transform_3, window_bounds = array<i64: 1, 1, 32>}, {pipeline_mode = #tpu.pipeline_mode<synchronous>, transform_indices = @transform_4, window_bounds = array<i64: 32, 32>}, {pipeline_mode = #tpu.pipeline_mode<synchronous>, transform_indices = @transform_5, window_bounds = array<i64: 1, 32>}, {pipeline_mode = #tpu.pipeline_mode<synchronous>, transform_indices = @transform_6, window_bounds = array<i64: 32, 32>}, {pipeline_mode = #tpu.pipeline_mode<synchronous>, transform_indices = @transform_7, window_bounds = array<i64: 1, 32>}, {pipeline_mode = #tpu.pipeline_mode<synchronous>, transform_indices = @transform_8, window_bounds = array<i64: 32, 256>}, {pipeline_mode = #tpu.pipeline_mode<synchronous>, transform_indices = @transform_9, window_bounds = array<i64: 3, 3, 256>}, {pipeline_mode = #tpu.pipeline_mode<synchronous>, transform_indices = @transform_10, window_bounds = array<i64: 1, 256>}, {transform_indices = @transform_11, window_bounds = array<i64: 1, 8, 256>}]} {
    %c0_i32 = arith.constant 0 : i32
    %0 = arith.cmpi eq, %arg1, %c0_i32 : i32
    %1 = arith.extui %0 : i1 to i32
    %c0_i32_0 = arith.constant 0 : i32
    %2 = arith.cmpi ne, %1, %c0_i32_0 : i32
    scf.if %2 {
      %106 = tpu.iota {dimensions = array<i32: 0>} : vector<256x8xi32>
      %107 = tpu.iota {dimensions = array<i32: 1>} : vector<256x8xi32>
      %c32_i32_71 = arith.constant 32 : i32
      %108 = vector.broadcast %c32_i32_71 : i32 to vector<256x8xi32>
      %109 = arith.muli %107, %108 : vector<256x8xi32>
      %110 = arith.cmpi sge, %106, %109 : vector<256x8xi32>
      %c32_i32_72 = arith.constant 32 : i32
      %111 = vector.broadcast %c32_i32_72 : i32 to vector<256x8xi32>
      %112 = arith.addi %109, %111 : vector<256x8xi32>
      %113 = arith.cmpi slt, %106, %112 : vector<256x8xi32>
      %114 = arith.andi %110, %113 : vector<256x8xi1>
      %115 = arith.extui %114 : vector<256x8xi1> to vector<256x8xi32>
      %116 = arith.sitofp %115 : vector<256x8xi32> to vector<256x8xf32>
      %c0_73 = arith.constant 0 : index
      %c0_74 = arith.constant 0 : index
      %117 = vector.load %arg14[%c0_73, %c0_74] : memref<256x8xf32, #tpu.memory_space<vmem>>, vector<256x8xf32>
      tpu.vector_store %arg14[%c0_73, %c0_74], %116 {strides = array<i32>} : memref<256x8xf32, #tpu.memory_space<vmem>>, vector<256x8xf32>,
      %118 = tpu.iota {dimensions = array<i32: 1>} : vector<8x256xi32>
      %119 = tpu.iota {dimensions = array<i32: 0>} : vector<8x256xi32>
      %c32_i32_75 = arith.constant 32 : i32
      %120 = vector.broadcast %c32_i32_75 : i32 to vector<8x256xi32>
      %121 = arith.muli %119, %120 : vector<8x256xi32>
      %122 = arith.cmpi sge, %118, %121 : vector<8x256xi32>
      %c32_i32_76 = arith.constant 32 : i32
      %123 = vector.broadcast %c32_i32_76 : i32 to vector<8x256xi32>
      %124 = arith.addi %121, %123 : vector<8x256xi32>
      %125 = arith.cmpi slt, %118, %124 : vector<8x256xi32>
      %126 = arith.andi %122, %125 : vector<8x256xi1>
      %127 = arith.extui %126 : vector<8x256xi1> to vector<8x256xi32>
      %128 = arith.sitofp %127 : vector<8x256xi32> to vector<8x256xf32>
      %c0_77 = arith.constant 0 : index
      %c0_78 = arith.constant 0 : index
      %129 = vector.load %arg15[%c0_77, %c0_78] : memref<8x256xf32, #tpu.memory_space<vmem>>, vector<8x256xf32>
      tpu.vector_store %arg15[%c0_77, %c0_78], %128 {strides = array<i32>} : memref<8x256xf32, #tpu.memory_space<vmem>>, vector<8x256xf32>,
    } else {
    }
    %c0 = arith.constant 0 : index
    %c0_1 = arith.constant 0 : index
    %c0_2 = arith.constant 0 : index
    %3 = vector.load %arg5[%c0, %c0_1, %c0_2] : memref<1x1x32xf32, #tpu.memory_space<vmem>>, vector<1x1x32xf32>
    %4 = vector.shape_cast %3 : vector<1x1x32xf32> to vector<1x32xf32>
    %5 = arith.negf %4 : vector<1x32xf32>
    %6 = math.exp %5 : vector<1x32xf32>
    %cst = arith.constant 1.000000e+00 : f32
    %7 = vector.broadcast %cst : f32 to vector<1x32xf32>
    %8 = arith.addf %7, %6 : vector<1x32xf32>
    %9 = arith.divf %7, %8 : vector<1x32xf32>
    %10 = arith.mulf %4, %9 : vector<1x32xf32>
    %c0_3 = arith.constant 0 : index
    %c0_4 = arith.constant 0 : index
    %11 = vector.load %arg6[%c0_3, %c0_4] : memref<32x32xf32, #tpu.memory_space<vmem>>, vector<32x32xf32>
    %cst_5 = arith.constant dense<0.000000e+00> : vector<1x32xf32>
    %12 = tpu.matmul %10, %11, %cst_5 {dimension_numbers = #tpu.dot_dimension_numbers<[1], [0], [0], [1], [0, 0, 1, 1], [], []>} : vector<1x32xf32>, vector<32x32xf32>, vector<1x32xf32> -> vector<1x32xf32>
    %c0_6 = arith.constant 0 : index
    %c0_7 = arith.constant 0 : index
    %13 = vector.load %arg7[%c0_6, %c0_7] : memref<1x32xf32, #tpu.memory_space<vmem>>, vector<1x32xf32>
    %14 = arith.addf %12, %13 : vector<1x32xf32>
    %c0_8 = arith.constant 0 : index
    %c0_9 = arith.constant 0 : index
    %15 = vector.load %arg8[%c0_8, %c0_9] : memref<32x32xf32, #tpu.memory_space<vmem>>, vector<32x32xf32>
    %cst_10 = arith.constant dense<0.000000e+00> : vector<1x32xf32>
    %16 = tpu.matmul %10, %15, %cst_10 {dimension_numbers = #tpu.dot_dimension_numbers<[1], [0], [0], [1], [0, 0, 1, 1], [], []>} : vector<1x32xf32>, vector<32x32xf32>, vector<1x32xf32> -> vector<1x32xf32>
    %c0_11 = arith.constant 0 : index
    %c0_12 = arith.constant 0 : index
    %17 = vector.load %arg9[%c0_11, %c0_12] : memref<1x32xf32, #tpu.memory_space<vmem>>, vector<1x32xf32>
    %18 = arith.addf %16, %17 : vector<1x32xf32>
    %c0_13 = arith.constant 0 : index
    %c0_14 = arith.constant 0 : index
    %19 = vector.load %arg10[%c0_13, %c0_14] : memref<32x256xf32, #tpu.memory_space<vmem>>, vector<32x256xf32>
    %cst_15 = arith.constant dense<0.000000e+00> : vector<1x256xf32>
    %20 = tpu.matmul %14, %19, %cst_15 {dimension_numbers = #tpu.dot_dimension_numbers<[1], [0], [0], [1], [0, 0, 1, 1], [], []>} : vector<1x32xf32>, vector<32x256xf32>, vector<1x256xf32> -> vector<1x256xf32>
    %c0_16 = arith.constant 0 : index
    %c0_17 = arith.constant 0 : index
    %21 = vector.load %arg10[%c0_16, %c0_17] : memref<32x256xf32, #tpu.memory_space<vmem>>, vector<32x256xf32>
    %cst_18 = arith.constant dense<0.000000e+00> : vector<1x256xf32>
    %22 = tpu.matmul %18, %21, %cst_18 {dimension_numbers = #tpu.dot_dimension_numbers<[1], [0], [0], [1], [0, 0, 1, 1], [], []>} : vector<1x32xf32>, vector<32x256xf32>, vector<1x256xf32> -> vector<1x256xf32>
    %c0_19 = arith.constant 0 : index
    %c0_20 = arith.constant 0 : index
    %c0_21 = arith.constant 0 : index
    %23 = vector.load %arg2[%c0_19, %c0_20, %c0_21] : memref<1x8x256xf32, #tpu.memory_space<vmem>>, vector<1x8x256xf32>
    %24 = vector.shape_cast %23 : vector<1x8x256xf32> to vector<8x256xf32>
    %c0_22 = arith.constant 0 : index
    %c0_23 = arith.constant 0 : index
    %c0_24 = arith.constant 0 : index
    %c0_25 = arith.constant 0 : index
    %25 = vector.load %arg3[%c0_22, %c0_23, %c0_24, %c0_25] : memref<1x1x1x256xf32, #tpu.memory_space<vmem>>, vector<1x1x1x256xf32>
    %26 = vector.shape_cast %25 : vector<1x1x1x256xf32> to vector<1x256xf32>
    %c0_26 = arith.constant 0 : index
    %c0_27 = arith.constant 0 : index
    %c0_28 = arith.constant 0 : index
    %c0_29 = arith.constant 0 : index
    %27 = vector.load %arg4[%c0_26, %c0_27, %c0_28, %c0_29] : memref<1x1x1x256xf32, #tpu.memory_space<vmem>>, vector<1x1x1x256xf32>
    %28 = vector.shape_cast %27 : vector<1x1x1x256xf32> to vector<1x256xf32>
    %29 = tpu.concatenate %26, %24, %28 in 0 : vector<1x256xf32>, vector<8x256xf32>, vector<1x256xf32> -> vector<10x256xf32>
    %c32_i32 = arith.constant 32 : i32
    %30 = tpu.dynamic_rotate %29 by %c32_i32 dim 1 : vector<10x256xf32>, i32 -> vector<10x256xf32>
    %c224_i32 = arith.constant 224 : i32
    %31 = tpu.dynamic_rotate %29 by %c224_i32 dim 1 : vector<10x256xf32>, i32 -> vector<10x256xf32>
    %c0_30 = arith.constant 0 : index
    %c0_31 = arith.constant 0 : index
    %c0_32 = arith.constant 0 : index
    %32 = vector.load %arg11[%c0_30, %c0_31, %c0_32] : memref<3x3x256xf32, #tpu.memory_space<vmem>>, vector<1x1x256xf32>
    %33 = vector.shape_cast %32 : vector<1x1x256xf32> to vector<1x256xf32>
    %34 = vector.broadcast %33 : vector<1x256xf32> to vector<10x256xf32>
    %35 = arith.mulf %34, %30 : vector<10x256xf32>
    %c0_33 = arith.constant 0 : index
    %c1 = arith.constant 1 : index
    %c0_34 = arith.constant 0 : index
    %36 = vector.load %arg11[%c0_33, %c1, %c0_34] : memref<3x3x256xf32, #tpu.memory_space<vmem>>, vector<1x1x256xf32>
    %37 = vector.shape_cast %36 : vector<1x1x256xf32> to vector<1x256xf32>
    %38 = vector.broadcast %37 : vector<1x256xf32> to vector<10x256xf32>
    %39 = arith.mulf %38, %29 : vector<10x256xf32>
    %40 = arith.addf %35, %39 : vector<10x256xf32>
    %c0_35 = arith.constant 0 : index
    %c2 = arith.constant 2 : index
    %c0_36 = arith.constant 0 : index
    %41 = vector.load %arg11[%c0_35, %c2, %c0_36] : memref<3x3x256xf32, #tpu.memory_space<vmem>>, vector<1x1x256xf32>
    %42 = vector.shape_cast %41 : vector<1x1x256xf32> to vector<1x256xf32>
    %43 = vector.broadcast %42 : vector<1x256xf32> to vector<10x256xf32>
    %44 = arith.mulf %43, %31 : vector<10x256xf32>
    %45 = arith.addf %40, %44 : vector<10x256xf32>
    %46 = vector.extract_strided_slice %45 {offsets = [0, 0], sizes = [8, 256], strides = [1, 1]} : vector<10x256xf32> to vector<8x256xf32>
    %c1_37 = arith.constant 1 : index
    %c0_38 = arith.constant 0 : index
    %c0_39 = arith.constant 0 : index
    %47 = vector.load %arg11[%c1_37, %c0_38, %c0_39] : memref<3x3x256xf32, #tpu.memory_space<vmem>>, vector<1x1x256xf32>
    %48 = vector.shape_cast %47 : vector<1x1x256xf32> to vector<1x256xf32>
    %49 = vector.broadcast %48 : vector<1x256xf32> to vector<10x256xf32>
    %50 = arith.mulf %49, %30 : vector<10x256xf32>
    %c1_40 = arith.constant 1 : index
    %c1_41 = arith.constant 1 : index
    %c0_42 = arith.constant 0 : index
    %51 = vector.load %arg11[%c1_40, %c1_41, %c0_42] : memref<3x3x256xf32, #tpu.memory_space<vmem>>, vector<1x1x256xf32>
    %52 = vector.shape_cast %51 : vector<1x1x256xf32> to vector<1x256xf32>
    %53 = vector.broadcast %52 : vector<1x256xf32> to vector<10x256xf32>
    %54 = arith.mulf %53, %29 : vector<10x256xf32>
    %55 = arith.addf %50, %54 : vector<10x256xf32>
    %c1_43 = arith.constant 1 : index
    %c2_44 = arith.constant 2 : index
    %c0_45 = arith.constant 0 : index
    %56 = vector.load %arg11[%c1_43, %c2_44, %c0_45] : memref<3x3x256xf32, #tpu.memory_space<vmem>>, vector<1x1x256xf32>
    %57 = vector.shape_cast %56 : vector<1x1x256xf32> to vector<1x256xf32>
    %58 = vector.broadcast %57 : vector<1x256xf32> to vector<10x256xf32>
    %59 = arith.mulf %58, %31 : vector<10x256xf32>
    %60 = arith.addf %55, %59 : vector<10x256xf32>
    %61 = vector.extract_strided_slice %60 {offsets = [1, 0], sizes = [8, 256], strides = [1, 1]} : vector<10x256xf32> to vector<8x256xf32>
    %62 = arith.addf %46, %61 : vector<8x256xf32>
    %c2_46 = arith.constant 2 : index
    %c0_47 = arith.constant 0 : index
    %c0_48 = arith.constant 0 : index
    %63 = vector.load %arg11[%c2_46, %c0_47, %c0_48] : memref<3x3x256xf32, #tpu.memory_space<vmem>>, vector<1x1x256xf32>
    %64 = vector.shape_cast %63 : vector<1x1x256xf32> to vector<1x256xf32>
    %65 = vector.broadcast %64 : vector<1x256xf32> to vector<10x256xf32>
    %66 = arith.mulf %65, %30 : vector<10x256xf32>
    %c2_49 = arith.constant 2 : index
    %c1_50 = arith.constant 1 : index
    %c0_51 = arith.constant 0 : index
    %67 = vector.load %arg11[%c2_49, %c1_50, %c0_51] : memref<3x3x256xf32, #tpu.memory_space<vmem>>, vector<1x1x256xf32>
    %68 = vector.shape_cast %67 : vector<1x1x256xf32> to vector<1x256xf32>
    %69 = vector.broadcast %68 : vector<1x256xf32> to vector<10x256xf32>
    %70 = arith.mulf %69, %29 : vector<10x256xf32>
    %71 = arith.addf %66, %70 : vector<10x256xf32>
    %c2_52 = arith.constant 2 : index
    %c2_53 = arith.constant 2 : index
    %c0_54 = arith.constant 0 : index
    %72 = vector.load %arg11[%c2_52, %c2_53, %c0_54] : memref<3x3x256xf32, #tpu.memory_space<vmem>>, vector<1x1x256xf32>
    %73 = vector.shape_cast %72 : vector<1x1x256xf32> to vector<1x256xf32>
    %74 = vector.broadcast %73 : vector<1x256xf32> to vector<10x256xf32>
    %75 = arith.mulf %74, %31 : vector<10x256xf32>
    %76 = arith.addf %71, %75 : vector<10x256xf32>
    %77 = vector.extract_strided_slice %76 {offsets = [2, 0], sizes = [8, 256], strides = [1, 1]} : vector<10x256xf32> to vector<8x256xf32>
    %78 = arith.addf %62, %77 : vector<8x256xf32>
    %c0_55 = arith.constant 0 : index
    %c0_56 = arith.constant 0 : index
    %79 = vector.load %arg12[%c0_55, %c0_56] : memref<1x256xf32, #tpu.memory_space<vmem>>, vector<1x256xf32>
    %80 = vector.broadcast %79 : vector<1x256xf32> to vector<8x256xf32>
    %81 = arith.addf %78, %80 : vector<8x256xf32>
    %82 = arith.addf %81, %24 : vector<8x256xf32>
    %c0_57 = arith.constant 0 : index
    %c0_58 = arith.constant 0 : index
    %83 = vector.load %arg14[%c0_57, %c0_58] : memref<256x8xf32, #tpu.memory_space<vmem>>, vector<256x8xf32>
    %c0_59 = arith.constant 0 : index
    %c0_60 = arith.constant 0 : index
    %84 = vector.load %arg15[%c0_59, %c0_60] : memref<8x256xf32, #tpu.memory_space<vmem>>, vector<8x256xf32>
    %cst_61 = arith.constant dense<0.000000e+00> : vector<8x8xf32>
    %85 = tpu.matmul %82, %83, %cst_61 {dimension_numbers = #tpu.dot_dimension_numbers<[1], [0], [0], [1], [0, 0, 1, 1], [], []>} : vector<8x256xf32>, vector<256x8xf32>, vector<8x8xf32> -> vector<8x8xf32>
    %cst_62 = arith.constant 3.125000e-02 : f32
    %86 = vector.broadcast %cst_62 : f32 to vector<8x8xf32>
    %87 = arith.mulf %85, %86 : vector<8x8xf32>
    %cst_63 = arith.constant dense<0.000000e+00> : vector<8x256xf32>
    %88 = tpu.matmul %87, %84, %cst_63 {dimension_numbers = #tpu.dot_dimension_numbers<[1], [0], [0], [1], [0, 0, 1, 1], [], []>} : vector<8x8xf32>, vector<8x256xf32>, vector<8x256xf32> -> vector<8x256xf32>
    %89 = arith.subf %82, %88 : vector<8x256xf32>
    %90 = arith.mulf %89, %89 : vector<8x256xf32>
    %cst_64 = arith.constant dense<0.000000e+00> : vector<8x8xf32>
    %91 = tpu.matmul %90, %83, %cst_64 {dimension_numbers = #tpu.dot_dimension_numbers<[1], [0], [0], [1], [0, 0, 1, 1], [], []>} : vector<8x256xf32>, vector<256x8xf32>, vector<8x8xf32> -> vector<8x8xf32>
    %cst_65 = arith.constant 3.125000e-02 : f32
    %92 = vector.broadcast %cst_65 : f32 to vector<8x8xf32>
    %93 = arith.mulf %91, %92 : vector<8x8xf32>
    %cst_66 = arith.constant 9.99999974E-6 : f32
    %94 = vector.broadcast %cst_66 : f32 to vector<8x8xf32>
    %95 = arith.addf %93, %94 : vector<8x8xf32>
    %96 = math.rsqrt %95 : vector<8x8xf32>
    %cst_67 = arith.constant dense<0.000000e+00> : vector<8x256xf32>
    %97 = tpu.matmul %96, %84, %cst_67 {dimension_numbers = #tpu.dot_dimension_numbers<[1], [0], [0], [1], [0, 0, 1, 1], [], []>} : vector<8x8xf32>, vector<8x256xf32>, vector<8x256xf32> -> vector<8x256xf32>
    %98 = vector.broadcast %20 : vector<1x256xf32> to vector<8x256xf32>
    %99 = arith.mulf %97, %98 : vector<8x256xf32>
    %100 = arith.mulf %89, %99 : vector<8x256xf32>
    %101 = vector.broadcast %22 : vector<1x256xf32> to vector<8x256xf32>
    %102 = arith.addf %100, %101 : vector<8x256xf32>
    %c0_68 = arith.constant 0 : index
    %c0_69 = arith.constant 0 : index
    %c0_70 = arith.constant 0 : index
    %103 = vector.load %arg13[%c0_68, %c0_69, %c0_70] : memref<1x8x256xf32, #tpu.memory_space<vmem>>, vector<1x8x256xf32>
    %104 = vector.shape_cast %103 : vector<1x8x256xf32> to vector<8x256xf32>
    %105 = vector.shape_cast %102 : vector<8x256xf32> to vector<1x8x256xf32>
    tpu.vector_store %arg13[%c0_68, %c0_69, %c0_70], %105 {strides = array<i32>} : memref<1x8x256xf32, #tpu.memory_space<vmem>>, vector<1x8x256xf32>,
    return
  }
  func.func @transform_0(%arg0: i32, %arg1: i32) -> (i32, i32, i32) {
    %c0_i32 = arith.constant 0 : i32
    %c0_i32_0 = arith.constant 0 : i32
    return %arg0, %arg1, %c0_i32 : i32, i32, i32
  }
  func.func @transform_1(%arg0: i32, %arg1: i32) -> (i32, i32, i32, i32) {
    %c0_i32 = arith.constant 0 : i32
    %c0_i32_0 = arith.constant 0 : i32
    %c0_i32_1 = arith.constant 0 : i32
    return %arg0, %arg1, %c0_i32, %c0_i32_0 : i32, i32, i32, i32
  }
  func.func @transform_2(%arg0: i32, %arg1: i32) -> (i32, i32, i32, i32) {
    %c0_i32 = arith.constant 0 : i32
    %c0_i32_0 = arith.constant 0 : i32
    %c0_i32_1 = arith.constant 0 : i32
    return %arg0, %arg1, %c0_i32, %c0_i32_0 : i32, i32, i32, i32
  }
  func.func @transform_3(%arg0: i32, %arg1: i32) -> (i32, i32, i32) {
    %c0_i32 = arith.constant 0 : i32
    %c0_i32_0 = arith.constant 0 : i32
    %c0_i32_1 = arith.constant 0 : i32
    return %arg0, %c0_i32, %c0_i32_0 : i32, i32, i32
  }
  func.func @transform_4(%arg0: i32, %arg1: i32) -> (i32, i32) {
    %c0_i32 = arith.constant 0 : i32
    %c0_i32_0 = arith.constant 0 : i32
    %c0_i32_1 = arith.constant 0 : i32
    return %c0_i32, %c0_i32_0 : i32, i32
  }
  func.func @transform_5(%arg0: i32, %arg1: i32) -> (i32, i32) {
    %c0_i32 = arith.constant 0 : i32
    %c0_i32_0 = arith.constant 0 : i32
    %c0_i32_1 = arith.constant 0 : i32
    return %c0_i32, %c0_i32_0 : i32, i32
  }
  func.func @transform_6(%arg0: i32, %arg1: i32) -> (i32, i32) {
    %c0_i32 = arith.constant 0 : i32
    %c0_i32_0 = arith.constant 0 : i32
    %c0_i32_1 = arith.constant 0 : i32
    return %c0_i32, %c0_i32_0 : i32, i32
  }
  func.func @transform_7(%arg0: i32, %arg1: i32) -> (i32, i32) {
    %c0_i32 = arith.constant 0 : i32
    %c0_i32_0 = arith.constant 0 : i32
    %c0_i32_1 = arith.constant 0 : i32
    return %c0_i32, %c0_i32_0 : i32, i32
  }
  func.func @transform_8(%arg0: i32, %arg1: i32) -> (i32, i32) {
    %c0_i32 = arith.constant 0 : i32
    %c0_i32_0 = arith.constant 0 : i32
    %c0_i32_1 = arith.constant 0 : i32
    return %c0_i32, %c0_i32_0 : i32, i32
  }
  func.func @transform_9(%arg0: i32, %arg1: i32) -> (i32, i32, i32) {
    %c0_i32 = arith.constant 0 : i32
    %c0_i32_0 = arith.constant 0 : i32
    %c0_i32_1 = arith.constant 0 : i32
    %c0_i32_2 = arith.constant 0 : i32
    return %c0_i32, %c0_i32_0, %c0_i32_1 : i32, i32, i32
  }
  func.func @transform_10(%arg0: i32, %arg1: i32) -> (i32, i32) {
    %c0_i32 = arith.constant 0 : i32
    %c0_i32_0 = arith.constant 0 : i32
    %c0_i32_1 = arith.constant 0 : i32
    return %c0_i32, %c0_i32_0 : i32, i32
  }
  func.func @transform_11(%arg0: i32, %arg1: i32) -> (i32, i32, i32) {
    %c0_i32 = arith.constant 0 : i32
    %c0_i32_0 = arith.constant 0 : i32
    return %arg0, %arg1, %c0_i32 : i32, i32, i32
  }
}

</mosaic_0001>

<bundles_post_ra>
// kernel: tpu_custom_call.1
= control target key start
LH: loop header
LB: loop body
LE: loop exit
PB: predicated region body
PF: predicated region fallthrough
CT: control target
= control target key end

     0   :  { %s3613_s0 = inlined_call_operand.hbm [shape: f32[2,16,256], index: 0, kind: input, shape index: {}]   ;;  %s3614_s1 = inlined_call_operand.hbm [shape: f32[2,2,1,256], index: 1, kind: input, shape index: {}]   ;;  %s3615_s2 = inlined_call_operand.hbm [shape: f32[2,2,1,256], index: 2, kind: input, shape index: {}]   ;;  %s3616_s3 = inlined_call_operand.vmem [shape: f32[2,1,32], index: 3, kind: input, shape index: {}]   ;;  %s3617_s4 = inlined_call_operand.hbm [shape: f32[32,32], index: 4, kind: input, shape index: {}]   ;;  %s3618_s5 = inlined_call_operand.vmem [shape: f32[1,32], index: 5, kind: input, shape index: {}]   ;;  %s3619_s6 = inlined_call_operand.hbm [shape: f32[32,32], index: 6, kind: input, shape index: {}]   ;;  %s3620_s7 = inlined_call_operand.vmem [shape: f32[1,32], index: 7, kind: input, shape index: {}]   ;;  %s3621_s8 = inlined_call_operand.hbm [shape: f32[32,256], index: 8, kind: input, shape index: {}]   ;;  %s3622_s9 = inlined_call_operand.vmem [shape: f32[3,3,256], index: 9, kind: input, shape index: {}]   ;;  %s3623_s10 = inlined_call_operand.vmem [shape: f32[1,256], index: 10, kind: input, shape index: {}]   ;;  %s3624_s11 = inlined_call_operand.hbm [shape: f32[2,16,256], index: 11, kind: output, shape index: {}]  }
   0x1   :  { %3654 = sst [smem:[#allocation32_spill]] %s3614_s1 }
   0x2   :  { %3655 = sst [smem:[#allocation33_spill]] %s3616_s3 }
   0x3   :  { %3656 = sst [smem:[#allocation34_spill]] %s3617_s4 }
   0x4   :  { %3657 = sst [smem:[#allocation35_spill]] %s3618_s5 }
   0x5   :  { %3658 = sst [smem:[#allocation36_spill]] %s3620_s7 }
   0x6   :  { %3659 = sst [smem:[#allocation37_spill]] %s3622_s9 }
   0x7   :  { %3660 = sst [smem:[#allocation38_spill]] %s3623_s10 }
   0x8   :  { %3661 = sst [smem:[#allocation39_spill]] %s3624_s11 }
   0x9   :  { %16 = vsyncpa [#allocation5], 0 }
   0xa   :  { %18 = vsyncpa [#allocation5 + $0x1], 0 }
   0xb   :  { %19 = vsyncpa [#allocation8], 0 }
   0xc   :  { %21 = vsyncpa [#allocation8 + $0x1], 0 }
   0xd   :  { %22 = vsyncpa [#allocation11], 0 }
   0xe   :  { %23 = vsyncpa [#allocation14], 0 }
   0xf   :  { %24 = vsyncpa [#allocation6], 0 }
  0x10   :  { %26 = vsyncpa [#allocation6 + $0x1], 0  ;;  %s2729_s17 = smov 0   ;;  %s2731_s18 = smov 0  }
  0x11   :  { %s2733_s19 = smov 0   ;;  %s2735_s20 = smov 0  }
  0x12   :  { %s2737_s21 = smov 0   ;;  %s2739_s22 = smov 0  }
  0x13   :  { %s2741_s23 = smov 0   ;;  %s2743_s24 = smov 0  }
  0x14 LB: > { %3662 = sst [smem:[#allocation21_spill]] %s2622_s17  ;;  %s2770_s25 = sadd.s32 4294967295, %s2650_s24   ;;  %s2650_s24 = sphi %s2743_s24, %s32_s24   ;;  %s2646_s23 = sphi %s2741_s23, %s3720_s23   ;;  %s2642_s22 = sphi %s2739_s22, %s3723_s22   ;;  %s2638_s21 = sphi %s2737_s21, %s3718_s21   ;;  %s2634_s20 = sphi %s2735_s20, %s3717_s20   ;;  %s2630_s19 = sphi %s2733_s19, %s3716_s19   ;;  %s2626_s18 = sphi %s2731_s18, %s3722_s18   ;;  %s2622_s17 = sphi %s2729_s17, %s3721_s17  }
  0x15   : > { %3663 = sst [smem:[#allocation22_spill]] %s2630_s19  ;;  %s1955_s26 = sadd.s32 4294967294, %s2650_s24  }
  0x16   : > { %3664 = sst [smem:[#allocation23_spill]] %s2634_s20  ;;  %p66_p0 = scmp.ne.s32.totalorder %s2626_s18, %s2622_s17 }
  0x17   : > { %3665 = sst [smem:[#allocation24_spill]] %s2642_s22  ;;  %p3628_p1 = scmp.eq.s32.totalorder %s2770_s25, 0 }
  0x18   : > { %3666 = sst [smem:[#allocation25_spill]] %s2646_s23  ;;  %p327_p3 = scmp.eq.s32.totalorder %s1955_s26, 3 }
  0x19   : > { %3667 = sst [smem:[#allocation26_spill]] %s2650_s24  ;;  %p2779_p4 = por %p3628_p1, %p66_p0 }
  0x1a   : > { %p1956_p5 = scmp.ge.s32.totalorder %s2650_s24, 1  ;;  %p2784_p6 = por %p327_p3, %p66_p0 }
  0x1b   : > { %s3668_s27 = scalar_select %p2779_p4, 1, 0 }
  0x1c   : > { %s3669_s28 = scalar_select %p2784_p6, 1, 0 }
  0x1d   : > { %p334_p7 = scmp.lt.s32.totalorder %s2650_s24, 5  ;;  %s2652_s30 = smov [#allocation10]  }
  0x1e   : > { %3670 = sst [smem:[#allocation27_spill]] %s3669_s28  ;;  %s346_s12 = sshll.u32 %s2652_s30, 4  ;;  %s347_s12 = int_to_ptr.vmem [resolvable:$true] %s346_s12 }
  0x1f   : > { %p2789_p8 = pnand %p1956_p5, %p334_p7  ;;  %s3673_s4 = sld [smem:[#allocation34_spill]] }
  0x21   : > { %s3671_s29 = scalar_select %p2789_p8, 1, 0 }
  0x22   : > { %p2251_p9 = pneg %p2789_p8 }
  0x24   : > { %p2797_p10 = pnand %p2251_p9, %p3628_p1 }
  0x25   : > { %s2366_s16 = scalar_lea.hbm %s3673_s4, 512 }
  0x26   : > { %s3672_s13 = scalar_select %p2797_p10, 1, 0 }
  0x27   : > { %p2367_p11 = scmp.ne.s32.totalorder %s3673_s4, %s2366_s16  ;;  %p2809_p12 = pneg %p2797_p10 }
  0x28   : > { %p2373_p3 = scmp.lt.u32.totalorder %s2366_s16, %s3673_s4 }
  0x29   : > { %s3674_s30 = scalar_select %p2809_p12, 1, 0 }
  0x2a   : > { %p2369_p13 = pnand %p2809_p12, %p2367_p11 }
  0x2c   : > { %p2370_p0 = pneg %p2369_p13 }
  0x2e   : > { %p2375_p5 = pnand %p2373_p3, %p2370_p0 }
  0x30   : > { %2378 = shalt.err (!%p2375_p5)
}
  0x31   : > { %s2379_s14 = scalar_lea.vmem %s347_s12, 512  ;;  %p2387_p2 = scmp.lt.s32.totalorder %s347_s12, %s347_s12 }
  0x32   : > { %p2380_p7 = scmp.ne.s32.totalorder %s347_s12, %s2379_s14  ;;  %p2388_p6 = scmp.lt.s32.totalorder %s2379_s14, %s2379_s14 }
  0x34   : > { %p2382_p9 = pnand %p2380_p7, %p2809_p12  ;;  %p2389_p4 = por %p2388_p6, %p2387_p2 }
  0x36   : > { %p2383_p1 = pneg %p2382_p9 }
  0x38   : > { %p2390_p8 = pnand %p2389_p4, %p2383_p1 }
  0x3a   : > { %2393 = shalt.err (!%p2390_p8)
}
  0x3b   : > { %s3631_s28 = smov 128   ;;  %s3632_s11 = smov 8  }
  0x3c   : > { %2254 = dma.hbm_to_vmem [thread:$0]  (!%p2797_p10), %s3673_s4, 512, %s347_s12, [#allocation11], %s3631_s28, %s3631_s28, %s3632_s11  }
  0x3d   : > { %s41_s16 = sadd.s32 1, %s2642_s22  ;;  %s44_s26 = sadd.s32 1, %s2646_s23 }
  0x3e   : > { %p42_p1 = scmp.ge.s32.totalorder %s41_s16, 2  ;;  %s53_s14 = sadd.s32 1, %s2630_s19 }
  0x3f   : > { %p60_p2 = scmp.ne.s32.totalorder %s2630_s19, %s2626_s18  ;;  %p61_p4 = scmp.eq.s32.totalorder %s2650_s24, 0 }
  0x40   : > { %s3725_s16 = smov (%p42_p1, %s41_s16), 0  ;;  %s3727_s26 = smov (!%p42_p1, %s44_s26), %s2646_s23 }
  0x41   : > { %3675 = sst [smem:[#allocation28_spill]] %s3725_s16  ;;  %s49_s7 = ssub.s32 %s2642_s22, %s3725_s16 }
  0x42   : > { %p46_p6 = scmp.ge.s32.totalorder %s3727_s26, 2  ;;  %p3676_p8 = scmp.eq.s32.totalorder %s2770_s25, 3 }
  0x43   : > { %p62_p13 = por %p61_p4, %p60_p2  ;;  %p2278_p0 = scmp.lt.s32.totalorder %s2650_s24, 4 }
  0x44   : > { %p2841_p11 = por %p3676_p8, %p60_p2  ;;  %s3729_s26 = smov (%p46_p6, %s3727_s26), 0 }
  0x45   : > { %3679 = sst [smem:[#allocation30_spill]] %s3729_s26  ;;  %s2849_s17 = sand.u32 1, %s2630_s19  }
  0x46   : > { %s3677_s12 = scalar_select %p2841_p11, 1, 0 }
  0x47   : > { %s1962_s15 = sshll.u32 %s2642_s22, 1  ;;  %s48_s28 = ssub.s32 %s2646_s23, %s3729_s26 }
  0x48   : > { %3678 = sst [smem:[#allocation29_spill]] %s3677_s12  ;;  %s1963_s11 = sshll.u32 %s2646_s23, 2 }
  0x49   : > { %s50_s4 = sor.u32 %s49_s7, %s48_s28  ;;  %s2855_s16 = sadd.s32 %s1963_s11, %s1962_s15 }
  0x4a   : > { %p51_p3 = scmp.eq.s32.totalorder %s50_s4, 0  ;;  %p2857_p5 = pnand %p2278_p0, %p62_p13 }
  0x4b   : > { %s419_s5 = sand.u32 1, %s2650_s24   ;;  %s3639_s10 = sshll.u32 %s2849_s17, 1 }
  0x4c   : > { %s3680_s12 = scalar_select %p2857_p5, 1, 0 }
  0x4d   : > { %s2864_s9 = scalar_select %p51_p3, %s2630_s19, %s53_s14  }
  0x4e   : > { %s3640_s20 = sshll.u32 %s2855_s16, 4  ;;  %s3682_s1 = sld [smem:[#allocation32_spill]] }
  0x4f   : > { %3681 = sst [smem:[#allocation31_spill]] %s2864_s9  ;;  %s423_s4 = scalar_lea.vmem [#allocation7], %s3639_s10 }
  0x50   : > { %s433_s28 = sshll.u32 %s423_s4, 4  ;;  %s2878_s11 = scalar_lea.sflag [#allocation8], %s419_s5  ;;  %s2876_s28 = int_to_ptr.vmem [resolvable:$true] %s433_s28 }
  0x51   : > { %p2884_p9 = pneg %p2857_p5 }
  0x53   : > { %s3683_s15 = scalar_select %p2884_p9, 1, 0 }
  0x54   : > { %s2872_s7 = scalar_lea.hbm %s3682_s1, %s3640_s20  ;;  %s2399_s10 = scalar_lea.hbm %s3682_s1, 128 }
  0x55   : > { %s2394_s14 = scalar_lea.hbm %s2872_s7, 32  ;;  %p2400_p4 = scmp.lt.u32.totalorder %s2872_s7, %s3682_s1 }
  0x56   : > { %p2395_p7 = scmp.ne.s32.totalorder %s2872_s7, %s2394_s14  ;;  %p2401_p6 = scmp.lt.u32.totalorder %s2399_s10, %s2394_s14 }
  0x57   : > { %p2403_p13 = scmp.lt.u32.totalorder %s2394_s14, %s2872_s7 }
  0x58   : > { %p2397_p1 = pnand %p2884_p9, %p2395_p7  ;;  %p2402_p8 = por %p2401_p6, %p2400_p4 }
  0x5a   : > { %p2398_p2 = pneg %p2397_p1  ;;  %p2404_p0 = por %p2403_p13, %p2402_p8 }
  0x5c   : > { %p2405_p3 = pnand %p2404_p0, %p2398_p2 }
  0x5e   : > { %2408 = shalt.err (!%p2405_p3)
}
  0x5f   : > { %s2409_s5 = scalar_lea.vmem %s2876_s28, 32  ;;  %s2655_s22 = smov [#allocation7]  }
  0x60   : > { %p2410_p7 = scmp.ne.s32.totalorder %s2876_s28, %s2409_s5  ;;  %s2414_s26 = sshll.u32 %s2655_s22, 4  ;;  %s2415_s26 = int_to_ptr.vmem [resolvable:$false] %s2414_s26 }
  0x61   : > { %s2416_s20 = scalar_lea.vmem %s2415_s26, 64  ;;  %p2417_p10 = scmp.lt.s32.totalorder %s2876_s28, %s2415_s26 }
  0x62   : > { %p2412_p1 = pnand %p2410_p7, %p2884_p9  ;;  %p2418_p12 = scmp.lt.s32.totalorder %s2416_s20, %s2409_s5 }
  0x64   : > { %p2413_p11 = pneg %p2412_p1  ;;  %p2419_p4 = por %p2418_p12, %p2417_p10 }
  0x66   : > { %p2420_p6 = pnand %p2419_p4, %p2413_p11 }
  0x68   : > { %2423 = shalt.err (!%p2420_p6)
}
  0x69   : > { %2267 = dma.hbm_to_vmem [thread:$0]  (!%p2857_p5), %s2872_s7, 32, %s2876_s28, %s2878_s11  }
  0x6a   : > { %s3684_s10 = sshll.u32 %s2855_s16, 4  ;;  %s2656_s1 = smov [#allocation12]  }
  0x6b   : > { %s2913_s22 = scalar_lea.hbm %s3615_s2, %s3684_s10  ;;  %s362_s26 = sshll.u32 %s2656_s1, 4  ;;  %s363_s26 = int_to_ptr.vmem [resolvable:$true] %s362_s26 }
  0x6c   : > { %s2657_s5 = smov [#allocation13]   ;;  %s2424_s19 = scalar_lea.hbm %s3619_s6, 512 }
  0x6d   : > { %s378_s20 = sshll.u32 %s2657_s5, 4  ;;  %p2425_p10 = scmp.ne.s32.totalorder %s3619_s6, %s2424_s19  ;;  %s379_s20 = int_to_ptr.vmem [resolvable:$true] %s378_s20 }
  0x6e   : > { %p3685_p12 = scmp.ne.s32.totalorder %s3674_s30, 0  ;;  %p2431_p8 = scmp.lt.u32.totalorder %s2424_s19, %s3619_s6 }
  0x70   : > { %p2427_p11 = pnand %p2425_p10, %p3685_p12 }
  0x72   : > { %p2428_p2 = pneg %p2427_p11 }
  0x74   : > { %p2433_p13 = pnand %p2431_p8, %p2428_p2 }
  0x76   : > { %2436 = shalt.err (!%p2433_p13)
}
  0x77   : > { %s2437_s1 = scalar_lea.vmem %s363_s26, 512  ;;  %p2445_p1 = scmp.lt.s32.totalorder %s363_s26, %s363_s26 }
  0x78   : > { %p2438_p0 = scmp.ne.s32.totalorder %s363_s26, %s2437_s1  ;;  %p2446_p4 = scmp.lt.s32.totalorder %s2437_s1, %s2437_s1 }
  0x7a   : > { %p2440_p3 = pnand %p2438_p0, %p3685_p12  ;;  %p2447_p6 = por %p2446_p4, %p2445_p1 }
  0x7c   : > { %p2441_p7 = pneg %p2440_p3 }
  0x7e   : > { %p2448_p5 = pnand %p2447_p6, %p2441_p7 }
  0x80   : > { %2451 = shalt.err (!%p2448_p5)
}
  0x81   : > { %p3686_p10 = scmp.ne.s32.totalorder %s3672_s13, 0  ;;  %s3687_s3 = smov 8  }
  0x82   : > { %s3688_s9 = smov 128   ;;  %s2452_s14 = scalar_lea.hbm %s3621_s8, 1024 }
  0x83   : > { %2257 = dma.hbm_to_vmem [thread:$0]  (!%p3686_p10), %s3619_s6, 512, %s363_s26, [#allocation11], %s3688_s9, %s3688_s9, %s3687_s3  }
  0x84   : > { %p2453_p11 = scmp.ne.s32.totalorder %s3621_s8, %s2452_s14  ;;  %p2459_p8 = scmp.lt.u32.totalorder %s2452_s14, %s3621_s8 }
  0x86   : > { %p2455_p5 = pnand %p2453_p11, %p3685_p12 }
  0x88   : > { %p2456_p2 = pneg %p2455_p5 }
  0x8a   : > { %p2461_p13 = pnand %p2459_p8, %p2456_p2 }
  0x8c   : > { %2464 = shalt.err (!%p2461_p13)
}
  0x8d   : > { %s2465_s1 = scalar_lea.vmem %s379_s20, 1024  ;;  %p2473_p1 = scmp.lt.s32.totalorder %s379_s20, %s379_s20 }
  0x8e   : > { %p2466_p0 = scmp.ne.s32.totalorder %s379_s20, %s2465_s1  ;;  %p2474_p4 = scmp.lt.s32.totalorder %s2465_s1, %s2465_s1 }
  0x90   : > { %p2468_p3 = pnand %p2466_p0, %p3685_p12  ;;  %p2475_p6 = por %p2474_p4, %p2473_p1 }
  0x92   : > { %p2469_p7 = pneg %p2468_p3 }
  0x94   : > { %p2476_p9 = pnand %p2475_p6, %p2469_p7 }
  0x96   : > { %2479 = shalt.err (!%p2476_p9)
}
  0x97   : > { %s2658_s26 = smov 256   ;;  %s2659_s3 = smov 16  }
  0x98   : > { %2260 = dma.hbm_to_vmem [thread:$0]  (!%p3686_p10), %s3621_s8, 1024, %s379_s20, [#allocation14], %s2658_s26, %s2658_s26, %s2659_s3  }
  0x99   : > { %s1961_s30 = sshll.u32 %s2849_s17, 4  ;;  %s1964_s19 = sshll.u32 %s2855_s16, 7 }
  0x9a   : > { %s2959_s14 = scalar_lea.hbm %s3613_s0, %s1964_s19  ;;  %s402_s4 = scalar_lea.vmem [#allocation4], %s1961_s30 }
  0x9b   : > { %s412_s5 = sshll.u32 %s402_s4, 4  ;;  %s3689_s7 = sshll.u32 %s2849_s17, 1  ;;  %s2963_s5 = int_to_ptr.vmem [resolvable:$true] %s412_s5 }
  0x9c   : > { %s444_s28 = scalar_lea.vmem [#allocation9], %s3689_s7  ;;  %s399_s20 = scalar_lea.sflag [#allocation5], %s2849_s17 }
  0x9d   : > { %s454_s13 = sshll.u32 %s444_s28, 4  ;;  %s2480_s16 = scalar_lea.hbm %s2959_s14, 256  ;;  %s2965_s13 = int_to_ptr.vmem [resolvable:$true] %s454_s13 }
  0x9e   : > { %p2481_p9 = scmp.ne.s32.totalorder %s2959_s14, %s2480_s16  ;;  %p3690_p12 = scmp.ne.s32.totalorder %s3683_s15, 0 }
  0x9f   : > { %s2485_s3 = scalar_lea.hbm %s3613_s0, 1024  ;;  %p2486_p5 = scmp.lt.u32.totalorder %s2959_s14, %s3613_s0 }
  0xa0   : > { %p2483_p10 = pnand %p2481_p9, %p3690_p12  ;;  %p2487_p2 = scmp.lt.u32.totalorder %s2485_s3, %s2480_s16 }
  0xa1   : > { %p2489_p13 = scmp.lt.u32.totalorder %s2480_s16, %s2959_s14 }
  0xa2   : > { %p2484_p11 = pneg %p2483_p10  ;;  %p2488_p8 = por %p2487_p2, %p2486_p5 }
  0xa4   : > { %p2490_p0 = por %p2489_p13, %p2488_p8 }
  0xa6   : > { %p2491_p3 = pnand %p2490_p0, %p2484_p11 }
  0xa8   : > { %2494 = shalt.err (!%p2491_p3)
}
  0xa9   : > { %s2495_s17 = scalar_lea.vmem %s2963_s5, 256  ;;  %s2660_s30 = smov [#allocation4]  }
  0xaa   : > { %p2496_p7 = scmp.ne.s32.totalorder %s2963_s5, %s2495_s17  ;;  %s2500_s19 = sshll.u32 %s2660_s30, 4  ;;  %s2501_s19 = int_to_ptr.vmem [resolvable:$false] %s2500_s19 }
  0xab   : > { %s2502_s24 = scalar_lea.vmem %s2501_s19, 512  ;;  %p2503_p6 = scmp.lt.s32.totalorder %s2963_s5, %s2501_s19 }
  0xac   : > { %p2498_p1 = pnand %p2496_p7, %p3690_p12  ;;  %p2504_p9 = scmp.lt.s32.totalorder %s2502_s24, %s2495_s17 }
  0xae   : > { %p2499_p4 = pneg %p2498_p1  ;;  %p2505_p10 = por %p2504_p9, %p2503_p6 }
  0xb0   : > { %p2506_p5 = pnand %p2505_p10, %p2499_p4 }
  0xb2   : > { %2509 = shalt.err (!%p2506_p5)
}
  0xb3   : > { %p3691_p11 = scmp.ne.s32.totalorder %s3680_s12, 0  ;;  %s2510_s10 = scalar_lea.hbm %s2913_s22, 32 }
  0xb4   : > { %p2511_p2 = scmp.ne.s32.totalorder %s2913_s22, %s2510_s10  ;;  %s2515_s28 = scalar_lea.hbm %s3615_s2, 128 }
  0xb5   : > { %2264 = dma.hbm_to_vmem [thread:$0]  (!%p3691_p11), %s2959_s14, 256, %s2963_s5, %s399_s20  }
  0xb6   : > { %p2513_p8 = pnand %p2511_p2, %p3690_p12  ;;  %p2516_p0 = scmp.lt.u32.totalorder %s2913_s22, %s3615_s2 }
  0xb7   : > { %p2517_p3 = scmp.lt.u32.totalorder %s2515_s28, %s2510_s10  ;;  %p2519_p1 = scmp.lt.u32.totalorder %s2510_s10, %s2913_s22 }
  0xb8   : > { %p2514_p13 = pneg %p2513_p8 }
  0xb9   : > { %p2518_p7 = por %p2517_p3, %p2516_p0 }
  0xbb   : > { %p2520_p4 = por %p2519_p1, %p2518_p7 }
  0xbd   : > { %p2521_p6 = pnand %p2520_p4, %p2514_p13 }
  0xbf   : > { %2524 = shalt.err (!%p2521_p6)
}
  0xc0   : > { %s2525_s14 = scalar_lea.vmem %s2965_s13, 32  ;;  %s2661_s5 = smov [#allocation9]  }
  0xc1   : > { %p2526_p9 = scmp.ne.s32.totalorder %s2965_s13, %s2525_s14  ;;  %s2530_s20 = sshll.u32 %s2661_s5, 4  ;;  %s2531_s20 = int_to_ptr.vmem [resolvable:$false] %s2530_s20 }
  0xc2   : > { %s2532_s26 = scalar_lea.vmem %s2531_s20, 64  ;;  %p2533_p2 = scmp.lt.s32.totalorder %s2965_s13, %s2531_s20 }
  0xc3   : > { %p2528_p10 = pnand %p2526_p9, %p3690_p12  ;;  %p2534_p8 = scmp.lt.s32.totalorder %s2532_s26, %s2525_s14 }
  0xc5   : > { %p2529_p5 = pneg %p2528_p10  ;;  %p2535_p0 = por %p2534_p8, %p2533_p2 }
  0xc7   : > { %p2536_p3 = pnand %p2535_p0, %p2529_p5 }
  0xc9   : > { %2539 = shalt.err (!%p2536_p3)
}
  0xca   : > { %2270 = dma.hbm_to_vmem [thread:$0]  (!%p3691_p11), %s2913_s22, 32, %s2965_s13, %s2878_s11  }
  0xcb   : > { %p3692_p13 = scmp.ne.s32.totalorder %s3671_s29, 0 }
  0xcc   : > { %s3014_s15 = sand.u32 (!%p3692_p13), 1, %s2626_s18   ;;  %p3693_p12 = scmp.ne.s32.totalorder (!%p3692_p13), %s3668_s27, 0 }
  0xcd   : > { %469 = sbr.rel (%p3692_p13) target bundleno = 1450 (0x5aa), region = 64  ;;  %s1974_s3 = sshll.u32 (!%p3692_p13), %s3014_s15, 4 }
  0xce   : > { %s472_s9 = scalar_lea.sflag (!%p3692_p13), [#allocation5], %s3014_s15  ;;  %s3018_s23 = scalar_lea.vmem (!%p3692_p13), [#allocation4], %s1974_s3 }
  0xd4   : > { %2601 = dma.done.wait (%p3693_p12), %s472_s9, 256  }
  0xd5   : > { %2603 = vsyncadd (%p3693_p12), %s472_s9, 4294967040  ;;  %s480_s29 = sand.u32 1, %s2770_s25   ;;  %s1975_s12 = sshll.u32 %s3014_s15, 1 }
  0xd6   : > { %s481_s11 = scalar_lea.sflag [#allocation8], %s480_s29  ;;  %s3026_s22 = scalar_lea.vmem [#allocation7], %s1975_s12 }
  0xd7   : > { %2605 = dma.done.wait (%p3693_p12), %s481_s11, 64  }
  0xd8   : > { %2607 = vsyncadd (%p3693_p12), %s481_s11, 4294967232  ;;  %s3032_s13 = scalar_lea.vmem [#allocation9], %s1975_s12  ;;  %p3694_p11 = scmp.eq.s32.totalorder %s2770_s25, 0 }
  0xda   : > { %2609 = dma.done.wait (%p3694_p11), [#allocation11], 1024   ;;  %p3695_p7 = pmov %p3694_p11 }
  0xdc   : > { %2611 = vsyncadd (%p3695_p7), [#allocation11], 4294966272  ;;  %p3696_p1 = pmov %p3695_p7 }
  0xde   : > { %2613 = dma.done.wait (%p3696_p1), [#allocation14], 1024   ;;  %p3697_p4 = pmov %p3696_p1 }
  0xdf   : > { %p557_p6 = scmp.lt.s32.totalorder %s2638_s21, 1  ;;  %s3698_s19 = sld [smem:[#allocation33_spill]] }
  0xe0   : > { %2615 = vsyncadd (%p3697_p4), [#allocation14], 4294966272  ;;  %s3050_s10 = scalar_lea.vmem [#allocation15], %s1974_s3  ;;  %s3699_s4 = sld [smem:[#allocation23_spill]] }
  0xe1   : > { %s3044_s17 = scalar_select %p557_p6, %s2638_s21, 1 }
  0xe5   : > { %s559_s24 = scalar_lea.vmem %s3698_s19, %s3044_s17 }
  0xe6   : > { %p1981_p9 = scmp.ne.s32.totalorder %s3699_s4, 0 }
  0xe7   : > { %v564_v0 = vlaneseq (!%p1981_p9)  ;;  %vm761_vm1 = vcmask (!%p1981_p9), 64512   ;;  %v2662_v12 = vmov (!%p1981_p9), 0.0  }
  0xe8   : > { %563 = sbr.rel (%p1981_p9) target bundleno = 276 (0x114), region = 92 }
  0xe9   : > { %v3053_v1 = vshrl.u32 (!%p1981_p9), %v564_v0, 7  ;;  %v3055_v2 = vand.u32 (!%p1981_p9), 127, %v564_v0 }
  0xeb   : > { %v3058_v3 = vmul.u32 (!%p1981_p9), 32, %v3055_v2  ;;  %v566_v4 = vadd.s32 (!%p1981_p9), 8, %v3053_v1  ;;  %v567_v5 = vadd.s32 (!%p1981_p9), 16, %v3053_v1  ;;  %v568_v6 = vadd.s32 (!%p1981_p9), 24, %v3053_v1 }
  0xec   : > { %v569_v7 = vadd.s32 (!%p1981_p9), 32, %v3053_v1  ;;  %v570_v9 = vadd.s32 (!%p1981_p9), 40, %v3053_v1  ;;  %v571_v10 = vadd.s32 (!%p1981_p9), 48, %v3053_v1  ;;  %v572_v11 = vadd.s32 (!%p1981_p9), 56, %v3053_v1 }
  0xed   : > { %vm600_vm0 = vcmp.ge.s32.totalorder (!%p1981_p9), %v3053_v1, %v3058_v3  ;;  %v3067_v8 = vadd.s32 (!%p1981_p9), 32, %v3058_v3  ;;  %vm601_vm2 = vcmp.ge.s32.totalorder (!%p1981_p9), %v566_v4, %v3058_v3  ;;  %vm602_vm5 = vcmp.ge.s32.totalorder (!%p1981_p9), %v567_v5, %v3058_v3 }
  0xee   : > { %vm603_vm8 = vcmp.ge.s32.totalorder (!%p1981_p9), %v568_v6, %v3058_v3  ;;  %vm604_vm10 = vcmp.ge.s32.totalorder (!%p1981_p9), %v569_v7, %v3058_v3  ;;  %v573_v14 = vadd.s32 (!%p1981_p9), 64, %v3053_v1  ;;  %v574_v15 = vadd.s32 (!%p1981_p9), 72, %v3053_v1 }
  0xef   : > { %vm633_vm3 = vcmp.lt.s32.totalorder %v3053_v1, %v3067_v8  ;;  %vm634_vm4 = vcmp.lt.s32.totalorder %v566_v4, %v3067_v8  ;;  %vm635_vm6 = vcmp.lt.s32.totalorder %v567_v5, %v3067_v8  ;;  %vm636_vm9 = vcmp.lt.s32.totalorder %v568_v6, %v3067_v8 }
  0xf0   : > { %vm665_vm7 = vmand %vm600_vm0, %vm633_vm3  ;;  %vm637_vm12 = vcmp.lt.s32.totalorder %v569_v7, %v3067_v8  ;;  %vm605_vm14 = vcmp.ge.s32.totalorder %v570_v9, %v3058_v3  ;;  %vm638_vm15 = vcmp.lt.s32.totalorder %v570_v9, %v3067_v8  ;;  %vm606_vm0 = vcmp.ge.s32.totalorder %v571_v10, %v3058_v3 }
  0xf1   : > { %v1982_v13 = vsel %vm665_vm7, 1.0, %v2662_v12  ;;  %vm666_vm11 = vmand %vm601_vm2, %vm634_vm4  ;;  %vm639_vm3 = vcmp.lt.s32.totalorder %v571_v10, %v3067_v8  ;;  %v575_v18 = vadd.s32 80, %v3053_v1  ;;  %v576_v19 = vadd.s32 88, %v3053_v1 }
  0xf2   : > { %762 = vst.msk [vmem:[#allocation2] sm:$0xff] %vm761_vm1, %v1982_v13  ;;  %v1983_v16 = vsel %vm666_vm11, 1.0, %v2662_v12  ;;  %vm667_vm13 = vmand %vm602_vm5, %vm635_vm6  ;;  %vm607_vm5 = vcmp.ge.s32.totalorder %v572_v11, %v3058_v3  ;;  %vm640_vm6 = vcmp.lt.s32.totalorder %v572_v11, %v3067_v8  ;;  %v577_v21 = vadd.s32 96, %v3053_v1 }
  0xf3   : > { %763 = vst.msk [vmem:[#allocation2 + $0x8] sm:$0xff] %vm761_vm1, %v1983_v16  ;;  %v1984_v17 = vsel %vm667_vm13, 1.0, %v2662_v12  ;;  %vm668_vm2 = vmand %vm603_vm8, %vm636_vm9  ;;  %vm608_vm8 = vcmp.ge.s32.totalorder %v573_v14, %v3058_v3  ;;  %vm641_vm9 = vcmp.lt.s32.totalorder %v573_v14, %v3067_v8  ;;  %v578_v24 = vadd.s32 104, %v3053_v1 }
  0xf4   : > { %764 = vst.msk [vmem:[#allocation2 + $0x10] sm:$0xff] %vm761_vm1, %v1984_v17  ;;  %v1985_v20 = vsel %vm668_vm2, 1.0, %v2662_v12  ;;  %vm669_vm4 = vmand %vm604_vm10, %vm637_vm12  ;;  %vm609_vm10 = vcmp.ge.s32.totalorder %v574_v15, %v3058_v3  ;;  %vm642_vm12 = vcmp.lt.s32.totalorder %v574_v15, %v3067_v8  ;;  %v579_v25 = vadd.s32 112, %v3053_v1 }
  0xf5   : > { %765 = vst.msk [vmem:[#allocation2 + $0x18] sm:$0xff] %vm761_vm1, %v1985_v20  ;;  %v1986_v22 = vsel %vm669_vm4, 1.0, %v2662_v12  ;;  %vm670_vm7 = vmand %vm605_vm14, %vm638_vm15  ;;  %vm610_vm14 = vcmp.ge.s32.totalorder %v575_v18, %v3058_v3  ;;  %vm643_vm15 = vcmp.lt.s32.totalorder %v575_v18, %v3067_v8  ;;  %v580_v28 = vadd.s32 120, %v3053_v1 }
  0xf6   : > { %766 = vst.msk [vmem:[#allocation2 + $0x20] sm:$0xff] %vm761_vm1, %v1986_v22  ;;  %v1987_v23 = vsel %vm670_vm7, 1.0, %v2662_v12  ;;  %vm671_vm11 = vmand %vm606_vm0, %vm639_vm3  ;;  %vm611_vm0 = vcmp.ge.s32.totalorder %v576_v19, %v3058_v3  ;;  %vm644_vm3 = vcmp.lt.s32.totalorder %v576_v19, %v3067_v8  ;;  %v581_v29 = vadd.s32 128, %v3053_v1 }
  0xf7   : > { %767 = vst.msk [vmem:[#allocation2 + $0x28] sm:$0xff] %vm761_vm1, %v1987_v23  ;;  %v1988_v26 = vsel %vm671_vm11, 1.0, %v2662_v12  ;;  %vm672_vm13 = vmand %vm607_vm5, %vm640_vm6  ;;  %vm612_vm5 = vcmp.ge.s32.totalorder %v577_v21, %v3058_v3  ;;  %vm645_vm6 = vcmp.lt.s32.totalorder %v577_v21, %v3067_v8  ;;  %v582_v31 = vadd.s32 136, %v3053_v1 }
  0xf8   : > { %768 = vst.msk [vmem:[#allocation2 + $0x30] sm:$0xff] %vm761_vm1, %v1988_v26  ;;  %v1989_v27 = vsel %vm672_vm13, 1.0, %v2662_v12  ;;  %vm673_vm2 = vmand %vm608_vm8, %vm641_vm9  ;;  %vm613_vm8 = vcmp.ge.s32.totalorder %v578_v24, %v3058_v3  ;;  %vm646_vm9 = vcmp.lt.s32.totalorder %v578_v24, %v3067_v8  ;;  %v583_v34 = vadd.s32 144, %v3053_v1 }
  0xf9   : > { %769 = vst.msk [vmem:[#allocation2 + $0x38] sm:$0xff] %vm761_vm1, %v1989_v27  ;;  %v1990_v30 = vsel %vm673_vm2, 1.0, %v2662_v12  ;;  %vm674_vm4 = vmand %vm609_vm10, %vm642_vm12  ;;  %vm614_vm10 = vcmp.ge.s32.totalorder %v579_v25, %v3058_v3  ;;  %vm647_vm12 = vcmp.lt.s32.totalorder %v579_v25, %v3067_v8  ;;  %v584_v35 = vadd.s32 152, %v3053_v1 }
  0xfa   : > { %770 = vst.msk [vmem:[#allocation2 + $0x40] sm:$0xff] %vm761_vm1, %v1990_v30  ;;  %v1991_v32 = vsel %vm674_vm4, 1.0, %v2662_v12  ;;  %vm675_vm7 = vmand %vm610_vm14, %vm643_vm15  ;;  %vm615_vm14 = vcmp.ge.s32.totalorder %v580_v28, %v3058_v3  ;;  %vm648_vm15 = vcmp.lt.s32.totalorder %v580_v28, %v3067_v8  ;;  %v585_v38 = vadd.s32 160, %v3053_v1 }
  0xfb   : > { %771 = vst.msk [vmem:[#allocation2 + $0x48] sm:$0xff] %vm761_vm1, %v1991_v32  ;;  %v1992_v33 = vsel %vm675_vm7, 1.0, %v2662_v12  ;;  %vm676_vm11 = vmand %vm611_vm0, %vm644_vm3  ;;  %vm616_vm0 = vcmp.ge.s32.totalorder %v581_v29, %v3058_v3  ;;  %vm649_vm3 = vcmp.lt.s32.totalorder %v581_v29, %v3067_v8  ;;  %v586_v39 = vadd.s32 168, %v3053_v1 }
  0xfc   : > { %772 = vst.msk [vmem:[#allocation2 + $0x50] sm:$0xff] %vm761_vm1, %v1992_v33  ;;  %v1993_v36 = vsel %vm676_vm11, 1.0, %v2662_v12  ;;  %vm677_vm13 = vmand %vm612_vm5, %vm645_vm6  ;;  %vm617_vm5 = vcmp.ge.s32.totalorder %v582_v31, %v3058_v3  ;;  %vm650_vm6 = vcmp.lt.s32.totalorder %v582_v31, %v3067_v8  ;;  %v587_v41 = vadd.s32 176, %v3053_v1 }
  0xfd   : > { %773 = vst.msk [vmem:[#allocation2 + $0x58] sm:$0xff] %vm761_vm1, %v1993_v36  ;;  %v1994_v37 = vsel %vm677_vm13, 1.0, %v2662_v12  ;;  %vm678_vm2 = vmand %vm613_vm8, %vm646_vm9  ;;  %vm618_vm8 = vcmp.ge.s32.totalorder %v583_v34, %v3058_v3  ;;  %vm651_vm9 = vcmp.lt.s32.totalorder %v583_v34, %v3067_v8  ;;  %v588_v44 = vadd.s32 184, %v3053_v1 }
  0xfe   : > { %774 = vst.msk [vmem:[#allocation2 + $0x60] sm:$0xff] %vm761_vm1, %v1994_v37  ;;  %v1995_v40 = vsel %vm678_vm2, 1.0, %v2662_v12  ;;  %vm679_vm4 = vmand %vm614_vm10, %vm647_vm12  ;;  %vm619_vm10 = vcmp.ge.s32.totalorder %v584_v35, %v3058_v3  ;;  %vm652_vm12 = vcmp.lt.s32.totalorder %v584_v35, %v3067_v8  ;;  %v589_v45 = vadd.s32 192, %v3053_v1 }
  0xff   : > { %775 = vst.msk [vmem:[#allocation2 + $0x68] sm:$0xff] %vm761_vm1, %v1995_v40  ;;  %v1996_v42 = vsel %vm679_vm4, 1.0, %v2662_v12  ;;  %vm680_vm7 = vmand %vm615_vm14, %vm648_vm15  ;;  %vm620_vm14 = vcmp.ge.s32.totalorder %v585_v38, %v3058_v3  ;;  %vm653_vm15 = vcmp.lt.s32.totalorder %v585_v38, %v3067_v8  ;;  %vm622_vm4 = vcmp.ge.s32.totalorder %v587_v41, %v3058_v3 }
 0x100   : > { %776 = vst.msk [vmem:[#allocation2 + $0x70] sm:$0xff] %vm761_vm1, %v1996_v42  ;;  %v1997_v43 = vsel %vm680_vm7, 1.0, %v2662_v12  ;;  %vm681_vm11 = vmand %vm616_vm0, %vm649_vm3  ;;  %vm621_vm0 = vcmp.ge.s32.totalorder %v586_v39, %v3058_v3  ;;  %vm654_vm3 = vcmp.lt.s32.totalorder %v586_v39, %v3067_v8  ;;  %v590_v48 = vadd.s32 200, %v3053_v1 }
 0x101   : > { %777 = vst.msk [vmem:[#allocation2 + $0x78] sm:$0xff] %vm761_vm1, %v1997_v43  ;;  %v1998_v46 = vsel %vm681_vm11, 1.0, %v2662_v12  ;;  %vm682_vm13 = vmand %vm617_vm5, %vm650_vm6  ;;  %vm655_vm6 = vcmp.lt.s32.totalorder %v587_v41, %v3067_v8  ;;  %v591_v50 = vadd.s32 208, %v3053_v1  ;;  %v592_v51 = vadd.s32 216, %v3053_v1 }
 0x102   : > { %778 = vst.msk [vmem:[#allocation2 + $0x80] sm:$0xff] %vm761_vm1, %v1998_v46  ;;  %v1999_v47 = vsel %vm682_vm13, 1.0, %v2662_v12  ;;  %vm683_vm2 = vmand %vm618_vm8, %vm651_vm9  ;;  %vm623_vm8 = vcmp.ge.s32.totalorder %v588_v44, %v3058_v3  ;;  %vm656_vm9 = vcmp.lt.s32.totalorder %v588_v44, %v3067_v8  ;;  %v593_v54 = vadd.s32 224, %v3053_v1 }
 0x103   : > { %779 = vst.msk [vmem:[#allocation2 + $0x88] sm:$0xff] %vm761_vm1, %v1999_v47  ;;  %v2000_v49 = vsel %vm683_vm2, 1.0, %v2662_v12  ;;  %vm684_vm5 = vmand %vm619_vm10, %vm652_vm12  ;;  %vm624_vm10 = vcmp.ge.s32.totalorder %v589_v45, %v3058_v3  ;;  %vm657_vm12 = vcmp.lt.s32.totalorder %v589_v45, %v3067_v8  ;;  %v594_v55 = vadd.s32 232, %v3053_v1 }
 0x104   : > { %780 = vst.msk [vmem:[#allocation2 + $0x90] sm:$0xff] %vm761_vm1, %v2000_v49  ;;  %v2001_v52 = vsel %vm684_vm5, 1.0, %v2662_v12  ;;  %vm685_vm7 = vmand %vm620_vm14, %vm653_vm15  ;;  %vm625_vm14 = vcmp.ge.s32.totalorder %v590_v48, %v3058_v3  ;;  %vm658_vm15 = vcmp.lt.s32.totalorder %v590_v48, %v3067_v8  ;;  %v795_v57 = vmul.u32 32, %v3053_v1 }
 0x105   : > { %781 = vst.msk [vmem:[#allocation2 + $0x98] sm:$0xff] %vm761_vm1, %v2001_v52  ;;  %v2002_v53 = vsel %vm685_vm7, 1.0, %v2662_v12  ;;  %vm686_vm11 = vmand %vm621_vm0, %vm654_vm3  ;;  %vm626_vm2 = vcmp.ge.s32.totalorder %v591_v50, %v3058_v3  ;;  %vm659_vm3 = vcmp.lt.s32.totalorder %v591_v50, %v3067_v8  ;;  %v595_v59 = vadd.s32 240, %v3053_v1 }
 0x106   : > { %782 = vst.msk [vmem:[#allocation2 + $0xa0] sm:$0xff] %vm761_vm1, %v2002_v53  ;;  %v2003_v56 = vsel %vm686_vm11, 1.0, %v2662_v12  ;;  %vm687_vm13 = vmand %vm622_vm4, %vm655_vm6  ;;  %vm627_vm5 = vcmp.ge.s32.totalorder %v592_v51, %v3058_v3  ;;  %vm660_vm6 = vcmp.lt.s32.totalorder %v592_v51, %v3067_v8  ;;  %v596_v61 = vadd.s32 248, %v3053_v1 }
 0x107   : > { %783 = vst.msk [vmem:[#allocation2 + $0xa8] sm:$0xff] %vm761_vm1, %v2003_v56  ;;  %v2004_v58 = vsel %vm687_vm13, 1.0, %v2662_v12  ;;  %vm688_vm0 = vmand %vm623_vm8, %vm656_vm9  ;;  %vm628_vm8 = vcmp.ge.s32.totalorder %v593_v54, %v3058_v3  ;;  %vm661_vm9 = vcmp.lt.s32.totalorder %v593_v54, %v3067_v8  ;;  %v798_v0 = vadd.s32 32, %v795_v57 }
 0x108   : > { %784 = vst.msk [vmem:[#allocation2 + $0xb0] sm:$0xff] %vm761_vm1, %v2004_v58  ;;  %v2005_v60 = vsel %vm688_vm0, 1.0, %v2662_v12  ;;  %vm689_vm4 = vmand %vm624_vm10, %vm657_vm12  ;;  %vm629_vm10 = vcmp.ge.s32.totalorder %v594_v55, %v3058_v3  ;;  %vm662_vm12 = vcmp.lt.s32.totalorder %v594_v55, %v3067_v8  ;;  %v794_v1 = vadd.s32 128, %v3055_v2 }
 0x109   : > { %785 = vst.msk [vmem:[#allocation2 + $0xb8] sm:$0xff] %vm761_vm1, %v2005_v60  ;;  %v2006_v62 = vsel %vm689_vm4, 1.0, %v2662_v12  ;;  %vm690_vm7 = vmand %vm625_vm14, %vm658_vm15  ;;  %vm630_vm14 = vcmp.ge.s32.totalorder %v595_v59, %v3058_v3  ;;  %vm663_vm15 = vcmp.lt.s32.totalorder %v595_v59, %v3067_v8 }
 0x10a   : > { %786 = vst.msk [vmem:[#allocation2 + $0xc0] sm:$0xff] %vm761_vm1, %v2006_v62  ;;  %v2007_v63 = vsel %vm690_vm7, 1.0, %v2662_v12  ;;  %vm691_vm11 = vmand %vm626_vm2, %vm659_vm3  ;;  %vm631_vm2 = vcmp.ge.s32.totalorder %v596_v61, %v3058_v3  ;;  %vm664_vm3 = vcmp.lt.s32.totalorder %v596_v61, %v3067_v8 }
 0x10b   : > { %787 = vst.msk [vmem:[#allocation2 + $0xc8] sm:$0xff] %vm761_vm1, %v2007_v63  ;;  %v2008_v4 = vsel %vm691_vm11, 1.0, %v2662_v12  ;;  %vm692_vm13 = vmand %vm627_vm5, %vm660_vm6  ;;  %vm796_vm5 = vcmp.ge.s32.totalorder %v3055_v2, %v795_v57  ;;  %vm799_vm6 = vcmp.lt.s32.totalorder %v3055_v2, %v798_v0 }
 0x10c   : > { %788 = vst.msk [vmem:[#allocation2 + $0xd0] sm:$0xff] %vm761_vm1, %v2008_v4  ;;  %v2009_v5 = vsel %vm692_vm13, 1.0, %v2662_v12  ;;  %vm693_vm0 = vmand %vm628_vm8, %vm661_vm9  ;;  %vm797_vm8 = vcmp.ge.s32.totalorder %v794_v1, %v795_v57  ;;  %vm800_vm9 = vcmp.lt.s32.totalorder %v794_v1, %v798_v0 }
 0x10d   : > { %789 = vst.msk [vmem:[#allocation2 + $0xd8] sm:$0xff] %vm761_vm1, %v2009_v5  ;;  %v2010_v6 = vsel %vm693_vm0, 1.0, %v2662_v12  ;;  %vm694_vm4 = vmand %vm629_vm10, %vm662_vm12 }
 0x10e   : > { %790 = vst.msk [vmem:[#allocation2 + $0xe0] sm:$0xff] %vm761_vm1, %v2010_v6  ;;  %v2011_v7 = vsel %vm694_vm4, 1.0, %v2662_v12  ;;  %vm695_vm7 = vmand %vm630_vm14, %vm663_vm15 }
 0x10f   : > { %791 = vst.msk [vmem:[#allocation2 + $0xe8] sm:$0xff] %vm761_vm1, %v2011_v7  ;;  %v2012_v9 = vsel %vm695_vm7, 1.0, %v2662_v12  ;;  %vm696_vm11 = vmand %vm631_vm2, %vm664_vm3 }
 0x110   : > { %792 = vst.msk [vmem:[#allocation2 + $0xf0] sm:$0xff] %vm761_vm1, %v2012_v9  ;;  %v2013_v3 = vsel %vm696_vm11, 1.0, %v2662_v12  ;;  %vm801_vm10 = vmand %vm796_vm5, %vm799_vm6 }
 0x111   : > { %793 = vst.msk [vmem:[#allocation2 + $0xf8] sm:$0xff] %vm761_vm1, %v2013_v3  ;;  %v2014_v2 = vsel %vm801_vm10, 1.0, %v2662_v12  ;;  %vm802_vm12 = vmand %vm797_vm8, %vm800_vm9 }
 0x112   : > { %807 = vst [vmem:[#allocation3] sm:$0xff] %v2014_v2  ;;  %v2015_v8 = vsel %vm802_vm12, 1.0, %v2662_v12 }
 0x113   : > { %808 = vst [vmem:[#allocation3 + $0x8] sm:$0xff] %v2015_v8 }
 0x114 PF: > { %v817_v10 = vld [vmem:[#allocation10] sm:$0xff]  ;;  %v818_v11 = vld [vmem:[#allocation10 + $0x8] sm:$0xff]  ;;  %v819_v13 = vld [vmem:[#allocation10 + $0x10] sm:$0xff]  ;;  %v1132_v14 = vlaneseq  ;;  %v2663_v15 = vmov 0.0|0.0   ;;  %vm2664_vm1 = vmmov 0   ;;  %v2665_v18 = vmov 0.0  }
 0x115   : > { %2139 = vmatprep.subr.bf16.mxu0 %v2663_v15  ;;  %v2140_v16 = vpack.c.bf16 %v818_v11, %v817_v10  ;;  %v820_v17 = vld [vmem:[#allocation10 + $0x18] sm:$0xff]  ;;  %2125 = vmatprep.mubr.msk.f32.mxu0 %vm2664_vm1, %v2665_v18  ;;  %v809_v12 = vld [vmem:[%s559_s24] sm:$0x1]  ;;  %v3348_v19 = vld [vmem:[%s3018_s23 + $0x8] sm:$0xff]  ;;  %vm1159_vm13 = vcmask 1040384   ;;  %s2666_s16 = smov 32  }
 0x116   : > { %v2016_v20 = vmul.f32 -1.442695, %v809_v12  ;;  %v1133_v21 = vshrl.u32 %v1132_v14, 7  ;;  %2145 = vmatprep.subr.bf16.mxu1 %v2663_v15  ;;  %2136 = vmatprep.mubr.msk.f32.mxu1 %vm2664_vm1, %v2665_v18  ;;  %v2143_v22 = vpack.c.bf16 %v820_v17, %v819_v13  ;;  %v1129_v23 = vld [vmem:[%s3026_s22] sm:$0x3]  ;;  %v1145_v24 = vrot.slane %v3348_v19, 7 }
 0x117   : > { %2141 = vmatpush3.bf16.msra.mxu0 %v2140_v16  ;;  %v3356_v25 = vld [vmem:[%s3018_s23] sm:$0xff]  ;;  %s2667_s1 = smov 96   ;;  %v971_v43 = vld [vmem:[#allocation13] sm:$0xff]  ;;  %v973_v44 = vld [vmem:[#allocation13 + $0x10] sm:$0xff]  ;;  %vm822_vm14 = vcmask 261120   ;;  %s3701_s20 = sld [smem:[#allocation37_spill]] }
 0x118   : > { %v1130_v26 = vld [vmem:[%s3032_s13] sm:$0x3]  ;;  %2142 = vmatprep.subr.bf16.mxu0 %v2663_v15  ;;  %2360 = vpow2.f32 %v2016_v20  ;;  %v3360_v27 = vsub.s32 0, %v1133_v21  ;;  %v3362_v28 = vsub.s32 1, %v1133_v21  ;;  %v1144_v29 = vrot.slane %v3356_v25, 7  ;;  %v972_v36 = vld [vmem:[#allocation13 + $0x8] sm:$0xff] }
 0x119   : > { %v974_v37 = vld [vmem:[#allocation13 + $0x18] sm:$0xff]  ;;  %v976_v45 = vld [vmem:[#allocation13 + $0x28] sm:$0xff]  ;;  %v3388_v48 = vpack.c.bf16 %v973_v44, %v971_v43  ;;  %v975_v51 = vld [vmem:[#allocation13 + $0x20] sm:$0xff]  ;;  %v3409_v58 = vand.u32 127, %v1132_v14  ;;  %vm1303_vm2 = vcmask 1046528   ;;  %vm1377_vm3 = vcmask 1045504  }
 0x11a   : > { %v1139_v30 = vrot.slane %v1129_v23, %v3362_v28  ;;  %v1135_v31 = vrot.slane %v1129_v23, %v3360_v27  ;;  %v1156_v32 = vrot.slane %v1130_v26, %v3362_v28  ;;  %v1152_v33 = vrot.slane %v1130_v26, %v3360_v27  ;;  %v978_v46 = vld [vmem:[#allocation13 + $0x38] sm:$0xff]  ;;  %v977_v52 = vld [vmem:[#allocation13 + $0x30] sm:$0xff]  ;;  %v1420_v54 = vld [vmem:[#allocation2 + $0x80] sm:$0xff]  ;;  %s3705_s23 = sld [smem:[#allocation36_spill]]  ;;  %s3706_s29 = sld [smem:[#allocation23_spill]] }
 0x11b   : > { %2144 = vmatpush3.bf16.msra.mxu0 %v2143_v22  ;;  %v3379_v40 = vpack.c.bf16 %v974_v37, %v972_v36  ;;  %v3392_v50 = vpack.c.bf16 %v978_v46, %v976_v45  ;;  %v3397_v53 = vpack.c.bf16 %v977_v52, %v975_v51  ;;  %v1421_v55 = vld [vmem:[#allocation2 + $0x88] sm:$0xff]  ;;  %vm1174_vm15 = vcmp.lt.s32.totalorder %v3409_v58, 32  ;;  %s2033_s11 = sshll.u32 %s2638_s21, 2  ;;  %s3707_s13 = sld [smem:[#allocation29_spill]] }
 0x11c   : > { %v3369_v34 = vsel %vm1159_vm13, %v1139_v30, %v1145_v24  ;;  %v3371_v35 = vsel %vm1159_vm13, %v1135_v31, %v1144_v29  ;;  %v3375_v38 = vsel %vm1159_vm13, %v1145_v24, %v1156_v32  ;;  %v3377_v39 = vsel %vm1159_vm13, %v1144_v29, %v1152_v33  ;;  %s1776_s27 = sshll.u32 %s3050_s10, 4  ;;  %s3708_s19 = sld [smem:[#allocation39_spill]]  ;;  %s3559_s27 = int_to_ptr.vmem [resolvable:$true] %s1776_s27 }
 0x11d   : > { %1168 = vrot.lane.b32.xlu1 %v3369_v34, %s2666_s16  ;;  %1164 = vrot.lane.b32.xlu0 %v3371_v35, %s2666_s16  ;;  %v3402_v56 = vpack.c.bf16 %v1421_v55, %v1420_v54  ;;  %s3702_s26 = smov %s3701_s20  ;;  %v2021_v57 = vld [vmem:[%s3701_s20 + $0x1] ss:$4 sm:$0x3]  ;;  %vm1187_vm0 = vcmp.lt.s32.totalorder %v3409_v58, 96  ;;  %s3704_s20 = sld [smem:[#allocation35_spill]]  ;;  %vm1509_vm4 = vcmask 64512  }
 0x11e   : > { %2152 = vmatprep.subr.bf16.mxu0 %v3379_v40  ;;  %v2024_v59 = vld [vmem:[%s3702_s26 + $0x9] ss:$4 sm:$0x3]  ;;  %v2027_v60 = vld [vmem:[%s3702_s26 + $0x11] ss:$4 sm:$0x3]  ;;  %v1212_v62 = vrot.slane %v2021_v57, %v3360_v27  ;;  %v1216_v63 = vrot.slane %v2021_v57, %v3362_v28 }
 0x11f   : > { %v1192_v61 = vld [vmem:[%s3702_s26] ss:$4 sm:$0x3]  ;;  %v2023_v0 = vld [vmem:[%s3702_s26 + $0x8] ss:$4 sm:$0x3]  ;;  %v1263_v1 = vrot.slane %v2024_v59, %v3360_v27  ;;  %v1267_v4 = vrot.slane %v2024_v59, %v3362_v28  ;;  %v1337_v6 = vrot.slane %v2027_v60, %v3360_v27  ;;  %v1341_v7 = vrot.slane %v2027_v60, %v3362_v28 }
 0x120   : > { %v2026_v5 = vld [vmem:[%s3702_s26 + $0x10] ss:$4 sm:$0x3]  ;;  %v1197_v9 = vrot.slane %v1192_v61, %v3360_v27  ;;  %v1201_v3 = vrot.slane %v1192_v61, %v3362_v28  ;;  %v1246_v2 = vrot.slane %v2023_v0, %v3360_v27  ;;  %v1250_v8 = vrot.slane %v2023_v0, %v3362_v28  ;;  %v2028_v60 = vld [vmem:[%s3702_s26 + $0x12] ss:$4 sm:$0x3] }
 0x121   : > { %1170 = vrot.lane.b32.xlu1 %v3375_v38, %s2666_s16  ;;  %1166 = vrot.lane.b32.xlu0 %v3377_v39, %s2666_s16  ;;  %v1220_v10 = vmul.f32 %v1216_v63, %v3369_v34  ;;  %v1320_v11 = vrot.slane %v2026_v5, %v3360_v27  ;;  %v1324_v13 = vrot.slane %v2026_v5, %v3362_v28  ;;  %v2022_v5 = vld [vmem:[%s3702_s26 + $0x2] ss:$4 sm:$0x3]  ;;  %s2032_s12 = sshll.u32 %s3706_s29, 1  ;;  %s1760_s25 = scalar_lea.sflag [#allocation6], %s3014_s15 }
 0x122   : > { %v2361_v41 = vpop.eup %2360  ;;  %v1219_v14 = vmul.f32 %v1212_v62, %v3371_v35  ;;  %v1271_v17 = vmul.f32 %v1267_v4, %v3369_v34  ;;  %v1270_v20 = vmul.f32 %v1263_v1, %v3371_v35  ;;  %v1272_v21 = vmul.f32 %v1263_v1, %v3377_v39  ;;  %s1772_s22 = sadd.s32 %s2033_s11, %s2032_s12  ;;  %s3709_s4 = smov %s3708_s19 }
 0x123   : > { %v813_v42 = vadd.f32 1.0, %v2361_v41  ;;  %v1273_v22 = vmul.f32 %v1267_v4, %v3375_v38  ;;  %v1345_v23 = vmul.f32 %v1341_v7, %v3369_v34  ;;  %v1344_v29 = vmul.f32 %v1337_v6, %v3371_v35  ;;  %s2034_s17 = sshll.u32 %s1772_s22, 7  ;;  %s2540_s7 = scalar_lea.vmem %s3559_s27, 256 }
 0x124   : > { %v1346_v41 = vmul.f32 %v1337_v6, %v3377_v39  ;;  %s3557_s24 = scalar_lea.hbm %s3708_s19, %s2034_s17  ;;  %p2541_p10 = scmp.ne.s32.totalorder %s3559_s27, %s2540_s7 }
 0x125   : > { %2362 = vrcp.f32 %v813_v42  ;;  %1181 = vrot.lane.b32.xlu1 %v3377_v39, %s2667_s1  ;;  %1179 = vrot.lane.b32.xlu0 %v3371_v35, %s2667_s1  ;;  %v1347_v42 = vmul.f32 %v1341_v7, %v3375_v38  ;;  %p3710_p5 = scmp.ne.s32.totalorder %s3707_s13, 0  ;;  %s2668_s28 = smov [#allocation15]  }
 0x126   : > { %s2544_s16 = sshll.u32 %s2668_s28, 4  ;;  %s2545_s16 = int_to_ptr.vmem [resolvable:$false] %s2544_s16 }
 0x127   : > { %p2542_p2 = pnand %p2541_p10, %p3710_p5  ;;  %p2547_p0 = scmp.lt.s32.totalorder %s3559_s27, %s2545_s16 }
 0x129   : > { %1185 = vrot.lane.b32.xlu1 %v3375_v38, %s2667_s1  ;;  %1183 = vrot.lane.b32.xlu0 %v3369_v34, %s2667_s1  ;;  %v2025_v38 = vld [vmem:[%s3702_s26 + $0xa] ss:$4 sm:$0x3]  ;;  %s3703_s1 = sld [smem:[#allocation38_spill]]  ;;  %p2543_p8 = pneg %p2542_p2 }
 0x12a   : > { %v1284_v6 = vrot.slane %v2025_v38, %v3360_v27  ;;  %v1288_v7 = vrot.slane %v2025_v38, %v3362_v28  ;;  %v899_v38 = vld [vmem:[#allocation12 + $0x18] sm:$0xff] }
 0x12f   : > { %v2363_v47 = vpop.eup %2362 }
 0x130   : > { %v3390_v49 = vmul.f32 %v2363_v47, %v809_v12 }
 0x132   : > { %2126 = vmatmul.mubr.msk.f32.vlgmr.msra.gmra.mrb[0].mxu0 %vm822_vm14, %v3390_v49 }
 0x133   : > { %2154 = vmatpush1.bf16.msra.mxu0 %v3388_v48  ;;  %1046 = vmatprep.mubr.f32.mxu0 %v2665_v18 }
 0x134   : > { %2156 = vmatprep.subr.bf16.mxu0 %v3392_v50 }
 0x137   : > { %2158 = vmatpush1.bf16.msra.mxu0 %v3397_v53 }
 0x138   : > { %2168 = vmatprep.subr.bf16.mxu0 %v3402_v56 }
 0x18f   : > { %v1169_v16 = vpop.permute.xlu1 %1168  ;;  %v1165_v12 = vpop.permute.xlu0 %1164 }
 0x190   : > { %v1175_v24 = vsel %vm1174_vm15, %v1165_v12, %v1169_v16  ;;  %v1177_v26 = vsel %vm1174_vm15, %v1169_v16, %v1165_v12 }
 0x191   : > { %v1204_v30 = vmul.f32 %v1197_v9, %v1177_v26  ;;  %v1205_v31 = vmul.f32 %v1201_v3, %v1175_v24  ;;  %v1253_v32 = vmul.f32 %v1246_v2, %v1177_v26  ;;  %v1254_v33 = vmul.f32 %v1250_v8, %v1175_v24 }
 0x192   : > { %v1327_v36 = vmul.f32 %v1320_v11, %v1177_v26  ;;  %v1328_v37 = vmul.f32 %v1324_v13, %v1175_v24  ;;  %v1358_v9 = vrot.slane %v2028_v60, %v3360_v27  ;;  %v1362_v3 = vrot.slane %v2028_v60, %v3362_v28 }
 0x193   : > { %v1221_v43 = vadd.f32 %v1219_v14, %v1204_v30  ;;  %v1222_v34 = vadd.f32 %v1220_v10, %v1205_v31  ;;  %v1274_v44 = vadd.f32 %v1270_v20, %v1253_v32  ;;  %v1275_v45 = vadd.f32 %v1271_v17, %v1254_v33  ;;  %v1171_v46 = vpop.permute.xlu1 %1170  ;;  %v1167_v47 = vpop.permute.xlu0 %1166 }
 0x194   : > { %v3453_v51 = vadd.f32 %v1344_v29, %v1327_v36  ;;  %v1349_v52 = vadd.f32 %v1345_v23, %v1328_v37  ;;  %v1176_v35 = vsel %vm1174_vm15, %v1167_v47, %v1171_v46  ;;  %v1178_v54 = vsel %vm1174_vm15, %v1171_v46, %v1167_v47  ;;  %v897_v46 = vld [vmem:[#allocation12 + $0x8] sm:$0xff] }
 0x195   : > { %v1255_v55 = vmul.f32 %v1246_v2, %v1178_v54  ;;  %v1256_v57 = vmul.f32 %v1250_v8, %v1176_v35  ;;  %v1329_v39 = vmul.f32 %v1320_v11, %v1178_v54  ;;  %v1330_v59 = vmul.f32 %v1324_v13, %v1176_v35 }
 0x196   : > { %v1229_v2 = vrot.slane %v2022_v5, %v3360_v27  ;;  %v1233_v8 = vrot.slane %v2022_v5, %v3362_v28 }
 0x197   : > { %v1276_v61 = vadd.f32 %v1272_v21, %v1255_v55  ;;  %v1277_v62 = vadd.f32 %v1273_v22, %v1256_v57  ;;  %v1350_v63 = vadd.f32 %v1346_v41, %v1329_v39  ;;  %v1351_v0 = vadd.f32 %v1347_v42, %v1330_v59  ;;  %v1182_v1 = vpop.permute.xlu1 %1181  ;;  %v1180_v4 = vpop.permute.xlu0 %1179  ;;  %v896_v42 = vld [vmem:[#allocation12] sm:$0xff]  ;;  %v898_v59 = vld [vmem:[#allocation12 + $0x10] sm:$0xff] }
 0x19b   : > { %v1186_v10 = vpop.permute.xlu1 %1185  ;;  %v1184_v11 = vpop.permute.xlu0 %1183 }
 0x19c   : > { %v1189_v13 = vsel %vm1187_vm0, %v1182_v1, %v1186_v10  ;;  %v1191_v14 = vsel %vm1187_vm0, %v1186_v10, %v1182_v1  ;;  %v1188_v16 = vsel %vm1187_vm0, %v1180_v4, %v1184_v11  ;;  %v1190_v17 = vsel %vm1187_vm0, %v1184_v11, %v1180_v4 }
 0x19d   : > { %v1293_v12 = vmul.f32 %v1284_v6, %v1189_v13  ;;  %v1294_v58 = vmul.f32 %v1288_v7, %v1191_v14  ;;  %v1367_v20 = vmul.f32 %v1358_v9, %v1189_v13  ;;  %v1368_v21 = vmul.f32 %v1362_v3, %v1191_v14 }
 0x19e   : > { %v1236_v22 = vmul.f32 %v1229_v2, %v1188_v16  ;;  %v1237_v23 = vmul.f32 %v1233_v8, %v1190_v17  ;;  %v1291_v24 = vmul.f32 %v1284_v6, %v1188_v16  ;;  %v1292_v26 = vmul.f32 %v1288_v7, %v1190_v17  ;;  %v1405_v2 = vld [vmem:[#allocation2 + $0x8] sm:$0xff]  ;;  %v1423_v8 = vld [vmem:[#allocation2 + $0x98] sm:$0xff] }
 0x19f   : > { %v1297_v29 = vadd.f32 %v1293_v12, %v1276_v61  ;;  %v1298_v30 = vadd.f32 %v1294_v58, %v1277_v62  ;;  %v1371_v31 = vadd.f32 %v1367_v20, %v1350_v63  ;;  %v1372_v32 = vadd.f32 %v1368_v21, %v1351_v0  ;;  %v1425_v12 = vld [vmem:[#allocation2 + $0xa8] sm:$0xff]  ;;  %v1408_v20 = vld [vmem:[#allocation2 + $0x20] sm:$0xff] }
 0x1a0   : > { %v1238_v33 = vadd.f32 %v1236_v22, %v1221_v43  ;;  %v1239_v36 = vadd.f32 %v1237_v23, %v1222_v34  ;;  %v1295_v37 = vadd.f32 %v1291_v24, %v1274_v44  ;;  %v1296_v41 = vadd.f32 %v1292_v26, %v1275_v45  ;;  %v1409_v21 = vld [vmem:[#allocation2 + $0x28] sm:$0xff]  ;;  %v1426_v22 = vld [vmem:[#allocation2 + $0xb0] sm:$0xff]  ;;  %v1427_v23 = vld [vmem:[#allocation2 + $0xb8] sm:$0xff] }
 0x1a1   : > { %v1305_v47 = vrot.slane %v1297_v29, 1  ;;  %v1308_v35 = vrot.slane %v1298_v30, 1  ;;  %v1365_v57 = vmul.f32 %v1358_v9, %v1188_v16  ;;  %v1366_v39 = vmul.f32 %v1362_v3, %v1190_v17  ;;  %v1407_v16 = vld [vmem:[#allocation2 + $0x18] sm:$0xff]  ;;  %v1424_v17 = vld [vmem:[#allocation2 + $0xa0] sm:$0xff]  ;;  %v1410_v29 = vld [vmem:[#allocation2 + $0x30] sm:$0xff] }
 0x1a2   : > { %v1304_v54 = vrot.slane %v1295_v37, 1  ;;  %v1307_v55 = vrot.slane %v1296_v41, 1  ;;  %v1379_v60 = vrot.slane %v1371_v31, 2  ;;  %v1382_v61 = vrot.slane %v1372_v32, 2  ;;  %v1411_v30 = vld [vmem:[#allocation2 + $0x38] sm:$0xff]  ;;  %v1428_v31 = vld [vmem:[#allocation2 + $0xc0] sm:$0xff] }
 0x1a3   : > { %v2146_v62 = vpack.c.bf16 %v897_v46, %v896_v42  ;;  %v1369_v43 = vadd.f32 %v1365_v57, %v3453_v51  ;;  %v1370_v34 = vadd.f32 %v1366_v39, %v1349_v52  ;;  %v2149_v1 = vpack.c.bf16 %v899_v38, %v898_v59  ;;  %v1404_v52 = vld [vmem:[#allocation2] sm:$0xff]  ;;  %v1429_v32 = vld [vmem:[#allocation2 + $0xc8] sm:$0xff]  ;;  %v1430_v42 = vld [vmem:[#allocation2 + $0xd0] sm:$0xff] }
 0x1a4   : > { %v1306_v63 = vsel %vm1303_vm2, %v1304_v54, %v1305_v47  ;;  %v1309_v0 = vsel %vm1303_vm2, %v1307_v55, %v1308_v35  ;;  %v3496_v10 = vpack.c.bf16 %v1405_v2, %v1404_v52  ;;  %v3512_v24 = vpack.c.bf16 %v1409_v21, %v1408_v20  ;;  %v1412_v37 = vld [vmem:[#allocation2 + $0x40] sm:$0xff]  ;;  %v1413_v41 = vld [vmem:[#allocation2 + $0x48] sm:$0xff]  ;;  %v1431_v46 = vld [vmem:[#allocation2 + $0xd8] sm:$0xff] }
 0x1a5   : > { %v1312_v44 = vadd.f32 %v1306_v63, %v1238_v33  ;;  %v1313_v45 = vadd.f32 %v1309_v0, %v1239_v36  ;;  %2147 = vmatpush3.bf16.msra.mxu1 %v2146_v62  ;;  %v1378_v4 = vrot.slane %v1369_v43, 2  ;;  %v1381_v5 = vrot.slane %v1370_v34, 2  ;;  %v1414_v54 = vld [vmem:[#allocation2 + $0x50] sm:$0xff]  ;;  %v1415_v55 = vld [vmem:[#allocation2 + $0x58] sm:$0xff]  ;;  %v1432_v57 = vld [vmem:[#allocation2 + $0xe0] sm:$0xff] }
 0x1a6   : > { %2148 = vmatprep.subr.bf16.mxu1 %v2663_v15  ;;  %v3489_v15 = vld [vmem:[%s3703_s1] sm:$0x3]  ;;  %v3515_v26 = vpack.c.bf16 %v1427_v23, %v1426_v22  ;;  %v3518_v33 = vpack.c.bf16 %v1411_v30, %v1410_v29  ;;  %v3521_v36 = vpack.c.bf16 %v1429_v32, %v1428_v31  ;;  %v2185_v47 = vpack.c.bf16 %v1413_v41, %v1412_v37  ;;  %v1433_v39 = vld [vmem:[#allocation2 + $0xe8] sm:$0xff]  ;;  %v1434_v62 = vld [vmem:[#allocation2 + $0xf0] sm:$0xff]  ;;  %s2546_s1 = scalar_lea.vmem %s2545_s16, 512 }
 0x1a7   : > { %v1380_v6 = vsel %vm1377_vm3, %v1378_v4, %v1379_v60  ;;  %v1383_v7 = vsel %vm1377_vm3, %v1381_v5, %v1382_v61  ;;  %v1397_v51 = vrot.slane %v3489_v15, %v3362_v28  ;;  %v1406_v28 = vld [vmem:[#allocation2 + $0x10] sm:$0xff]  ;;  %v2187_v35 = vpack.c.bf16 %v1431_v46, %v1430_v42  ;;  %v1416_v60 = vld [vmem:[#allocation2 + $0x60] sm:$0xff]  ;;  %v1417_v61 = vld [vmem:[#allocation2 + $0x68] sm:$0xff]  ;;  %p2548_p3 = scmp.lt.s32.totalorder %s2546_s1, %s2540_s7 }
 0x1a8   : > { %v3477_v9 = vadd.f32 %v1380_v6, %v1312_v44  ;;  %v1387_v3 = vadd.f32 %v1383_v7, %v1313_v45  ;;  %v3505_v58 = vpack.c.bf16 %v1407_v16, %v1406_v28  ;;  %v2189_v59 = vpack.c.bf16 %v1415_v55, %v1414_v54  ;;  %v1435_v63 = vld [vmem:[#allocation2 + $0xf8] sm:$0xff]  ;;  %v1418_v44 = vld [vmem:[#allocation2 + $0x70] sm:$0xff]  ;;  %v900_v6 = vld [vmem:[%s3705_s23] sm:$0x1] }
 0x1a9   : > { %2150 = vmatpush3.bf16.msra.mxu1 %v2149_v1  ;;  %v2191_v38 = vpack.c.bf16 %v1433_v39, %v1432_v57  ;;  %v2193_v0 = vpack.c.bf16 %v1417_v61, %v1416_v60  ;;  %v1393_v43 = vrot.slane %v3489_v15, %v3360_v27  ;;  %v2195_v34 = vpack.c.bf16 %v1435_v63, %v1434_v62  ;;  %v1419_v45 = vld [vmem:[#allocation2 + $0x78] sm:$0xff]  ;;  %v1437_v7 = vld [vmem:[#allocation3 + $0x8] sm:$0xff]  ;;  %v1436_v15 = vld [vmem:[#allocation3] sm:$0xff]  ;;  %p2549_p13 = por %p2548_p3, %p2547_p0 }
 0x1aa   : > { %2160 = vmatprep.subr.bf16.mxu1 %v3379_v40  ;;  %v1401_v40 = vadd.f32 %v1397_v51, %v1387_v3  ;;  %v2197_v1 = vpack.c.bf16 %v1419_v45, %v1418_v44 }
 0x1ab   : > { %v1400_v4 = vadd.f32 %v1393_v43, %v3477_v9  ;;  %p2550_p12 = pnand %p2549_p13, %p2543_p8 }
 0x1ac   : > { %2137 = vmatmul.mubr.msk.f32.vlgmr.msra.gmra.mrb[0].mxu1 %vm822_vm14, %v3390_v49  ;;  %v1422_v49 = vld [vmem:[#allocation2 + $0x90] sm:$0xff] }
 0x1ad   : > { %2162 = vmatpush1.bf16.msra.mxu1 %v3388_v48  ;;  %1120 = vmatprep.mubr.f32.mxu1 %v2665_v18  ;;  %v821_v48 = vld [vmem:[%s3704_s20] sm:$0x1]  ;;  %v3501_v14 = vpack.c.bf16 %v1423_v8, %v1422_v49  ;;  %v1402_v5 = vadd.f32 %v1400_v4, %v3356_v25 }
 0x1ae   : > { %2164 = vmatprep.subr.bf16.mxu1 %v3392_v50 }
 0x1b1   : > { %2166 = vmatpush1.bf16.msra.mxu1 %v3397_v53  ;;  %v3499_v53 = vadd.f32 %v1401_v40, %v3348_v19  ;;  %v3509_v19 = vpack.c.bf16 %v1425_v12, %v1424_v17 }
 0x1b2   : > { %1513 = vmatprep.subr.mxu1 %v1437_v7 }
 0x205   : > { %v892_v50 = vpop.f32.mrb[0].mxu0 }
 0x206   : > { %v893_v11 = vadd.f32 %v892_v50, %v821_v48  ;;  %v2127_v13 = vpop.f32.mrb[1].mxu0 }
 0x208   : > { %2019 = vmatmul.mubr.msk.f32.vlgmr.msra.gmra.mrb[2].mxu0 %vm822_vm14, %v893_v11 }
 0x209   : > { %2170 = vmatpush3.bf16.msra.mxu0 %v3496_v10  ;;  %1502 = vmatprep.mubr.f32.mxu0 %v3499_v53 }
 0x20a   : > { %2172 = vmatprep.subr.bf16.mxu0 %v3501_v14 }
 0x20d   : > { %2174 = vmatpush3.bf16.msra.mxu0 %v3505_v58 }
 0x20e   : > { %2176 = vmatprep.subr.bf16.mxu0 %v3509_v19 }
 0x211   : > { %2178 = vmatpush3.bf16.msra.mxu0 %v3512_v24 }
 0x212   : > { %2180 = vmatprep.subr.bf16.mxu0 %v3515_v26 }
 0x215   : > { %2182 = vmatpush3.bf16.msra.mxu0 %v3518_v33 }
 0x216   : > { %2184 = vmatprep.subr.bf16.mxu0 %v3521_v36 }
 0x219   : > { %2186 = vmatpush3.bf16.msra.mxu0 %v2185_v47 }
 0x21a   : > { %2188 = vmatprep.subr.bf16.mxu0 %v2187_v35 }
 0x21d   : > { %2190 = vmatpush3.bf16.msra.mxu0 %v2189_v59 }
 0x21e   : > { %2192 = vmatprep.subr.bf16.mxu0 %v2191_v38 }
 0x221   : > { %2194 = vmatpush3.bf16.msra.mxu0 %v2193_v0 }
 0x222   : > { %2196 = vmatprep.subr.bf16.mxu0 %v2195_v34 }
 0x225   : > { %2198 = vmatpush3.bf16.msra.mxu0 %v2197_v1 }
 0x226   : > { %1664 = vmatprep.subr.mxu0 %v1437_v7 }
 0x228   : > { %1503 = vmatmul.mubr.f32.vlgmr.msra.gmra.mrb[4].mxu0 %v1402_v5 }
 0x229   : > { %1728 = vmatprep.mubr.f32.mxu0 %v2665_v18  ;;  %1665 = vmatpush1.msra.mxu0 %v1436_v15 }
 0x27f   : > { %v967_v3 = vpop.f32.mrb[0].mxu1 }
 0x280   : > { %v968_v51 = vadd.f32 %v967_v3, %v900_v6  ;;  %v2138_v40 = vpop.f32.mrb[1].mxu1 }
 0x282   : > { %2020 = vmatmul.mubr.msk.f32.vlgmr.msra.gmra.mrb[2].mxu1 %vm822_vm14, %v968_v51 }
 0x283   : > { %1514 = vmatpush1.msra.mxu1 %v1436_v15  ;;  %1577 = vmatprep.mubr.f32.mxu1 %v2665_v18 }
 0x284   : > { %2200 = vmatprep.subr.bf16.mxu1 %v3402_v56 }
 0x2db   : > { %v1048_v25 = vpop.f32.mrb[2].mxu0 }
 0x2dc   : > { %v1050_v9 = vpop.f32.mrb[3].mxu0  ;;  %v1738_v20 = vrot.slane %v1048_v25, %v3360_v27 }
 0x2fb   : > { %v2079_v52 = vpop.f32.mrb[4].mxu0 }
 0x2fc   : > { %v2080_v2 = vpop.f32.mrb[5].mxu0 }
 0x2fd   : > { %v2081_v48 = vadd.f32 %v2080_v2, %v2079_v52 }
 0x2ff   : > { %v1508_v49 = vmul.f32 0.03125, %v2081_v48 }
 0x301   : > { %2029 = vmatmul.mubr.msk.f32.vlgmr.msra.gmra.mrb[4].mxu1 %vm1509_vm4, %v1508_v49 }
 0x302   : > { %2202 = vmatpush3.bf16.msra.mxu1 %v3496_v10 }
 0x303   : > { %2204 = vmatprep.subr.bf16.mxu1 %v3501_v14 }
 0x306   : > { %2206 = vmatpush3.bf16.msra.mxu1 %v3505_v58 }
 0x307   : > { %2208 = vmatprep.subr.bf16.mxu1 %v3509_v19 }
 0x30a   : > { %2210 = vmatpush3.bf16.msra.mxu1 %v3512_v24 }
 0x30b   : > { %2212 = vmatprep.subr.bf16.mxu1 %v3515_v26 }
 0x30e   : > { %2214 = vmatpush3.bf16.msra.mxu1 %v3518_v33 }
 0x30f   : > { %2216 = vmatprep.subr.bf16.mxu1 %v3521_v36 }
 0x312   : > { %2218 = vmatpush3.bf16.msra.mxu1 %v2185_v47 }
 0x313   : > { %2220 = vmatprep.subr.bf16.mxu1 %v2187_v35 }
 0x316   : > { %2222 = vmatpush3.bf16.msra.mxu1 %v2189_v59 }
 0x317   : > { %2224 = vmatprep.subr.bf16.mxu1 %v2191_v38 }
 0x31a   : > { %2226 = vmatpush3.bf16.msra.mxu1 %v2193_v0 }
 0x31b   : > { %2228 = vmatprep.subr.bf16.mxu1 %v2195_v34 }
 0x31e   : > { %2230 = vmatpush3.bf16.msra.mxu1 %v2197_v1 }
 0x355   : > { %v1122_v18 = vpop.f32.mrb[2].mxu1 }
 0x356   : > { %v1124_v56 = vpop.f32.mrb[3].mxu1  ;;  %v1750_v26 = vrot.slane %v1122_v18, %v3360_v27 }
 0x357   : > { %v1754_v30 = vrot.slane %v1124_v56, %v3360_v27 }
 0x3d4   : > { %v1579_v8 = vpop.f32.mrb[4].mxu1 }
 0x3d5   : > { %v1584_v50 = vsub.f32 %v1402_v5, %v1579_v8  ;;  %v1581_v10 = vpop.f32.mrb[5].mxu1 }
 0x3d6   : > { %v1585_v11 = vsub.f32 %v3499_v53, %v1581_v10  ;;  %v1742_v53 = vrot.slane %v1050_v9, %v3360_v27 }
 0x3d7   : > { %v1586_v14 = vmul.f32 %v1584_v50, %v1584_v50 }
 0x3d8   : > { %v1587_v13 = vmul.f32 %v1585_v11, %v1585_v11 }
 0x3da   : > { %1652 = vmatprep.mubr.f32.mxu1 %v1587_v13 }
 0x3db   : > { %1653 = vmatmul.mubr.f32.vlgmr.msra.gmra.mrb[6].mxu1 %v1586_v14 }
 0x4ae   : > { %v2114_v28 = vpop.f32.mrb[6].mxu1 }
 0x4af   : > { %v2115_v16 = vpop.f32.mrb[7].mxu1 }
 0x4b0   : > { %v2116_v17 = vadd.f32 %v2115_v16, %v2114_v28 }
 0x4b2   : > { %v1658_v12 = vmul.f32 0.03125, %v2116_v17 }
 0x4b4   : > { %v1659_v58 = vadd.f32 1e-05, %v1658_v12 }
 0x4b6   : > { %2364 = vrsqrt.f32 %v1659_v58 }
 0x4c0   : > { %v2365_v19 = vpop.eup %2364 }
 0x4c1   : > { %2030 = vmatmul.mubr.msk.f32.vlgmr.msra.gmra.mrb[6].mxu0 %vm1509_vm4, %v2365_v19 }
 0x594   : > { %v1730_v21 = vpop.f32.mrb[6].mxu0 }
 0x595   : > { %v1743_v22 = vmul.f32 %v1738_v20, %v1730_v21  ;;  %v1732_v23 = vpop.f32.mrb[7].mxu0 }
 0x596   : > { %v1744_v24 = vmul.f32 %v1742_v53, %v1732_v23 }
 0x597   : > { %v1745_v29 = vmul.f32 %v1743_v22, %v1584_v50 }
 0x598   : > { %v1746_v31 = vmul.f32 %v1744_v24, %v1585_v11 }
 0x599   : > { %v1755_v32 = vadd.f32 %v1750_v26, %v1745_v29 }
 0x59a   : > { %v1756_v33 = vadd.f32 %v1754_v30, %v1746_v31 }
 0x59b   : > { %1757 = vst [vmem:[%s3050_s10] sm:$0xff] %v1755_v32 }
 0x59c   : > { %1758 = vst [vmem:[%s3050_s10 + $0x8] sm:$0xff] %v1756_v33 }
 0x59d   : > { %2553 = shalt.err (!%p2550_p12)
}
 0x59e   : > { %s2554_s15 = scalar_lea.hbm %s3557_s24, 256  ;;  %s2558_s5 = scalar_lea.hbm %s3709_s4, 1024 }
 0x59f   : > { %p2555_p11 = scmp.ne.s32.totalorder %s3557_s24, %s2554_s15  ;;  %p2559_p4 = scmp.lt.u32.totalorder %s3557_s24, %s3709_s4 }
 0x5a0   : > { %p2560_p6 = scmp.lt.u32.totalorder %s2558_s5, %s2554_s15  ;;  %p2562_p10 = scmp.lt.u32.totalorder %s2554_s15, %s3557_s24 }
 0x5a1   : > { %p2556_p7 = pnand %p2555_p11, %p3710_p5 }
 0x5a2   : > { %p2561_p9 = por %p2560_p6, %p2559_p4 }
 0x5a3   : > { %p2557_p1 = pneg %p2556_p7 }
 0x5a4   : > { %p2563_p2 = por %p2562_p10, %p2561_p9 }
 0x5a6   : > { %p2564_p8 = pnand %p2563_p2, %p2557_p1 }
 0x5a8   : > { %2567 = shalt.err (!%p2564_p8)
}
 0x5a9   : > { %2249 = dma.vmem_to_hbm [thread:$0]  (%p3710_p5), %s3559_s27, 256, %s3557_s24, %s1760_s25  }
 0x5aa PF: > { %s3711_s9 = sld [smem:[#allocation26_spill]]  ;;  %s3712_s23 = sld [smem:[#allocation21_spill]] }
 0x5ab   : > { %s3713_s29 = sld [smem:[#allocation27_spill]] }
 0x5b0   : > { %p2282_p0 = scmp.ge.s32.totalorder %s3711_s9, 2  ;;  %s1788_s12 = sand.u32 1, %s3712_s23  }
 0x5b1   : > { %p3714_p3 = scmp.ne.s32.totalorder %s3713_s29, 0  ;;  %s1789_s11 = scalar_lea.sflag [#allocation6], %s1788_s12 }
 0x5b3   : > { %p2272_p13 = pnand %p2282_p0, %p3714_p3 }
 0x5b5   : > { %2617 = dma.done.wait (!%p2272_p13), %s1789_s11, 256  }
 0x5b6   : > { %2619 = vsyncadd (!%p2272_p13), %s1789_s11, 4294967040  ;;  %s32_s24 = sadd.s32 1, %s3711_s9   ;;  %s3715_s22 = sld [smem:[#allocation22_spill]] }
 0x5b7   : > { %p29_p12 = scmp.ge.s32.totalorder %s32_s24, 6   ;;  %s3716_s19 = sld [smem:[#allocation31_spill]] }
 0x5b8   : > { %s3717_s20 = sld [smem:[#allocation24_spill]]  ;;  %s3718_s21 = sld [smem:[#allocation25_spill]] }
 0x5b9   : > { %s3719_s13 = sld [smem:[#allocation28_spill]]  ;;  %s3720_s23 = sld [smem:[#allocation30_spill]] }
 0x5ba   : > { %s3721_s17 = smov %s2626_s18  ;;  %31 = sbr.rel (!%p29_p12) target bundleno = 20 (0x14), region = 160 }
 0x5bc   : > { %s3722_s18 = smov %s3715_s22 }
 0x5bf   : > { %s3723_s22 = smov %s3719_s13 }
 0x5c1   :  { %1794 = vsyncpa [#allocation5], 1 }
 0x5c2   :  { %1796 = vsyncpa [#allocation5 + $0x1], 1 }
 0x5c3   :  { %1797 = vsyncpa [#allocation8], 1 }
 0x5c4   :  { %1799 = vsyncpa [#allocation8 + $0x1], 1 }
 0x5c5   :  { %1800 = vsyncpa [#allocation11], 1 }
 0x5c6   :  { %1801 = vsyncpa [#allocation14], 1 }
 0x5c7   :  { %1802 = vsyncpa [#allocation6], 1 }
 0x5c8   :  { %1804 = vsyncpa [#allocation6 + $0x1], 1 }

</bundles_post_ra>
